<compile_context>
chip_gen: v6e
topology: v6e:2x2x1
jax: 0.10.0
libtpu: 0.0.40
codegen_flags: <defaults>
</compile_context>

<pallas_src>
import functools

import jax
import jax.numpy as jnp
from jax.experimental import pallas as pl
from jax.experimental.pallas import tpu as pltpu

CHAR_EMBED = 50      # self.char_embed_size
MAX_WORD = 21        # self.max_word_len
KERNEL_K = 5         # CNN kernel width (standard a5 assignment CNN)


def _round_up(x, m):
    return (x + m - 1) // m * m


def _char_cnn_highway_kernel(ids_ref, tfold_ref, bconv_ref, wpg_ref, bpg_ref, o_ref):
    """One tile of TN words: folded gather+conv -> max-over-time -> bias+ReLU -> Highway."""
    w, tn = ids_ref.shape                       # ids are time-major: ids_ref[w', n]
    k_width, v_pad, e_pad = tfold_ref.shape
    l_out = w - k_width + 1

    # 1) One lane-dense one-hot over the padded char vocab, time-major rows (w'*tn + n).
    ids3 = ids_ref[...].reshape(w, tn, 1)                                # int32 (tiny)
    lane = jax.lax.broadcasted_iota(jnp.int32, (w, tn, v_pad), 2)
    onehot = (lane == ids3).astype(jnp.bfloat16).reshape(w * tn, v_pad)  # (w*tn, V_pad)

    # 2) Conv1d with the char table folded into per-shift weights:
    #      conv[t*tn + n, :] = sum_k tfold[k, ids[n, t+k], :]
    #    5 accumulating MXU matmuls, each reading a 16-aligned row window of the shared
    #    one-hot (no im2col concat / relayout).
    m = l_out * tn
    conv = jnp.dot(onehot[0:m], tfold_ref[0], preferred_element_type=jnp.float32)
    for k in range(1, k_width):
        conv = conv + jnp.dot(onehot[k * tn:k * tn + m], tfold_ref[k],
                              preferred_element_type=jnp.float32)        # (l_out*tn, E_pad)

    # 3) Max over time (free leading-dim split, aligned VPU maxes), then bias+ReLU after
    #    the max — mathematically identical since both are monotone.
    y = jnp.max(conv.reshape(l_out, tn, e_pad), axis=0)                  # (tn, E_pad)
    y = jnp.maximum(y + bconv_ref[...], 0.0)

    # 4) Highway with proj|gate fused into one matmul (f32 accumulate, 128-aligned split).
    z = jnp.dot(y.astype(jnp.bfloat16), wpg_ref[...],
                preferred_element_type=jnp.float32) + bpg_ref[...]       # (tn, 2*E_pad)
    proj = jnp.maximum(z[:, :e_pad], 0.0)
    gate = jax.nn.sigmoid(z[:, e_pad:])
    o_ref[...] = (gate * proj + (1.0 - gate) * y).astype(o_ref.dtype)


@functools.partial(jax.jit, static_argnames=("embed_size", "row_tile"))
def model_embeddings_forward(char_ids, kparams, *, embed_size, row_tile=256):
    """char_ids: int32 (sent_len, batch, max_word) -> f32 (sent_len, batch, embed_size)."""
    sent_len, batch, max_word = char_ids.shape
    n = sent_len * batch
    ids = char_ids.reshape(n, max_word).astype(jnp.int32)

    tfold = kparams["tfold"]     # (K, V_pad, E_pad)  bf16  (table folded into conv weights)
    bconv = kparams["bconv"]     # (1, E_pad)         f32
    wpg = kparams["wpg"]         # (E_pad, 2*E_pad)   bf16
    bpg = kparams["bpg"]         # (1, 2*E_pad)       f32
    k_width, v_pad, e_pad = tfold.shape

    # Row tile: multiple of 16 (bf16 sublane tile), capped so the grid has >=2 steps
    # whenever possible (both v7x TensorCores get row tiles).
    tn = min(_round_up(row_tile, 16), _round_up(max((n + 1) // 2, 1), 16))
    n_pad = _round_up(n, tn)
    if n_pad != n:
        ids = jnp.pad(ids, ((0, n_pad - n), (0, 0)))
    grid = n_pad // tn

    # Time-major per-tile char ids: block i is (max_word, tn) — the transpose is done once
    # here in plain XLA so the kernel never relayouts the big intermediates.
    ids_t = ids.reshape(grid, tn, max_word).transpose(0, 2, 1)           # (grid, W, tn)

    vmem_limit = (24 if tn <= 256 else 40) * 1024 * 1024                 # actual need + headroom

    out = pl.pallas_call(
        _char_cnn_highway_kernel,
        out_shape=jax.ShapeDtypeStruct((n_pad, e_pad), jnp.float32),
        grid_spec=pltpu.PrefetchScalarGridSpec(
            num_scalar_prefetch=0,
            grid=(grid,),
            in_specs=[
                pl.BlockSpec((None, max_word, tn), lambda i: (i, 0, 0)),     # char ids (time-major)
                pl.BlockSpec((k_width, v_pad, e_pad), lambda i: (0, 0, 0)),  # folded conv weights
                pl.BlockSpec((1, e_pad), lambda i: (0, 0)),                  # conv bias
                pl.BlockSpec((e_pad, 2 * e_pad), lambda i: (0, 0)),          # highway proj|gate W
                pl.BlockSpec((1, 2 * e_pad), lambda i: (0, 0)),              # highway proj|gate b
            ],
            out_specs=pl.BlockSpec((tn, e_pad), lambda i: (i, 0)),
        ),
        compiler_params=pltpu.CompilerParams(
            dimension_semantics=("parallel",),
            vmem_limit_bytes=vmem_limit),
    )(ids_t, tfold, bconv, wpg, bpg)

    # TODO(synk): training-mode dropout omitted (identity in eval mode).
    return out[:n, :embed_size].reshape(sent_len, batch, embed_size)


def init_params(key, *, vocab_chars, embed_size, pad_idx=0):
    """Module-layout parameters.  Weights are bf16-rounded so kernel/reference see the
    exact same values; biases stay f32."""
    ks = jax.random.split(key, 7)
    bf = lambda a: a.astype(jnp.bfloat16).astype(jnp.float32)  # noqa: E731
    char_emb = bf(0.1 * jax.random.normal(ks[0], (vocab_chars, CHAR_EMBED), jnp.float32))
    char_emb = char_emb.at[pad_idx].set(0.0)   # padding_idx row is zero
    wconv = bf(0.1 * jax.random.normal(ks[1], (KERNEL_K, CHAR_EMBED, embed_size), jnp.float32))
    bconv = 0.1 * jax.random.normal(ks[2], (1, embed_size), jnp.float32)
    wproj = bf(0.1 * jax.random.normal(ks[3], (embed_size, embed_size), jnp.float32))
    bproj = 0.1 * jax.random.normal(ks[4], (1, embed_size), jnp.float32)
    wgate = bf(0.1 * jax.random.normal(ks[5], (embed_size, embed_size), jnp.float32))
    bgate = 0.1 * jax.random.normal(ks[6], (1, embed_size), jnp.float32)
    return dict(char_emb=char_emb, wconv=wconv, bconv=bconv,
                wproj=wproj, bproj=bproj, wgate=wgate, bgate=bgate)


def pack_kernel_params(raw):
    """Pad / fold module-layout params into the MXU-friendly kernel layout."""
    vocab, c = raw["char_emb"].shape
    k, _, e = raw["wconv"].shape
    e_pad = _round_up(e, 128)
    v_pad = _round_up(vocab, 128)

    table = jnp.zeros((v_pad, c), jnp.float32).at[:vocab].set(raw["char_emb"])
    wconv = jnp.zeros((k, c, e_pad), jnp.float32).at[:, :, :e].set(raw["wconv"])
    # Fold the char-embedding table into per-shift conv weights (perf-review item 1):
    #   conv[t, n, :] = sum_k tfold[k, ids[n, t + k], :]
    tfold = jnp.einsum("vc,kcf->kvf", table, wconv).astype(jnp.bfloat16)   # (K, V_pad, E_pad)

    bconv = jnp.zeros((1, e_pad), jnp.float32).at[:, :e].set(raw["bconv"])

    def pad_sq(wm):
        return jnp.zeros((e_pad, e_pad), jnp.bfloat16).at[:e, :e].set(wm.astype(jnp.bfloat16))

    wpg = jnp.concatenate([pad_sq(raw["wproj"]), pad_sq(raw["wgate"])], axis=1)
    bpg = jnp.concatenate(
        [jnp.zeros((1, e_pad), jnp.float32).at[:, :e].set(raw["bproj"]),
         jnp.zeros((1, e_pad), jnp.float32).at[:, :e].set(raw["bgate"])], axis=1)
    return dict(tfold=tfold, bconv=bconv, wpg=wpg, bpg=bpg)


def reference_forward(char_ids, raw, *, embed_size):
    """Pure-JAX reference (independent conv implementation, module layout)."""
    emb = raw["char_emb"][char_ids]                     # (S, B, W, C)
    s, b, w, c = emb.shape
    x = emb.reshape(s * b, w, c).transpose(0, 2, 1)     # NCW, like PyTorch
    w_ock = jnp.transpose(raw["wconv"], (2, 1, 0))      # Conv1d weight (F, C, K)
    conv = jax.lax.conv_general_dilated(
        x, w_ock, window_strides=(1,), padding="VALID",
        dimension_numbers=("NCH", "OIH", "NCH"))
    conv = conv + raw["bconv"].reshape(1, -1, 1)
    y = jnp.max(jax.nn.relu(conv), axis=2)              # (N, F)
    proj = jax.nn.relu(y @ raw["wproj"] + raw["bproj"])
    gate = jax.nn.sigmoid(y @ raw["wgate"] + raw["bgate"])
    out = gate * proj + (1.0 - gate) * y
    return out.reshape(s, b, embed_size)


if __name__ == "__main__":
    embed_size = 32
    vocab_chars = 30
    sent_len, batch = 6, 4

    key = jax.random.PRNGKey(0)
    k_params, k_ids = jax.random.split(key)
    raw = init_params(k_params, vocab_chars=vocab_chars, embed_size=embed_size)
    kparams = pack_kernel_params(raw)
    char_ids = jax.random.randint(
        k_ids, (sent_len, batch, MAX_WORD), 0, vocab_chars, dtype=jnp.int32)

    out = model_embeddings_forward(char_ids, kparams, embed_size=embed_size)
    out = jax.block_until_ready(out)

    ref = reference_forward(char_ids, raw, embed_size=embed_size)
    assert out.shape == (sent_len, batch, embed_size), out.shape
    max_err = float(jnp.max(jnp.abs(out - ref)))
    assert max_err < 1e-2, max_err   # bf16 MXU inputs / folded-table bf16 rounding

    print("KERNEL_OK")
</pallas_src>

<mosaic_0001>
module attributes {stable_mosaic.version = 11 : i64} {
  func.func @_char_cnn_highway_kernel(%arg0: i32, %arg1: memref<1x21x16xi32, #tpu.memory_space<vmem>>, %arg2: memref<5x128x128xbf16, #tpu.memory_space<vmem>>, %arg3: memref<1x128xf32, #tpu.memory_space<vmem>>, %arg4: memref<128x256xbf16, #tpu.memory_space<vmem>>, %arg5: memref<1x256xf32, #tpu.memory_space<vmem>>, %arg6: memref<16x128xf32, #tpu.memory_space<vmem>>) attributes {dimension_semantics = [#tpu.dimension_semantics<parallel>], iteration_bounds = array<i64: 2>, scalar_prefetch = 0 : i64, scratch_operands = 0 : i64, tpu.core_type = #tpu.core_type<tc>, window_params = [{transform_indices = @transform_0, window_bounds = array<i64: 1, 21, 16>}, {pipeline_mode = #tpu.pipeline_mode<synchronous>, transform_indices = @transform_1, window_bounds = array<i64: 5, 128, 128>}, {pipeline_mode = #tpu.pipeline_mode<synchronous>, transform_indices = @transform_2, window_bounds = array<i64: 1, 128>}, {pipeline_mode = #tpu.pipeline_mode<synchronous>, transform_indices = @transform_3, window_bounds = array<i64: 128, 256>}, {pipeline_mode = #tpu.pipeline_mode<synchronous>, transform_indices = @transform_4, window_bounds = array<i64: 1, 256>}, {transform_indices = @transform_5, window_bounds = array<i64: 16, 128>}]} {
    %c0 = arith.constant 0 : index
    %c0_0 = arith.constant 0 : index
    %c0_1 = arith.constant 0 : index
    %0 = vector.load %arg1[%c0, %c0_0, %c0_1] : memref<1x21x16xi32, #tpu.memory_space<vmem>>, vector<1x21x16xi32>
    %1 = vector.shape_cast %0 : vector<1x21x16xi32> to vector<21x16xi32>
    %2 = vector.shape_cast %1 : vector<21x16xi32> to vector<21x16x1xi32>
    %3 = tpu.iota {dimensions = array<i32: 2>} : vector<21x16x128xi32>
    %4 = vector.broadcast %2 : vector<21x16x1xi32> to vector<21x16x128xi32>
    %5 = arith.cmpi eq, %3, %4 : vector<21x16x128xi32>
    %6 = arith.extui %5 : vector<21x16x128xi1> to vector<21x16x128xi32>
    %7 = arith.sitofp %6 : vector<21x16x128xi32> to vector<21x16x128xf32>
    %8 = arith.truncf %7 : vector<21x16x128xf32> to vector<21x16x128xbf16>
    %9 = vector.shape_cast %8 : vector<21x16x128xbf16> to vector<336x128xbf16>
    %10 = vector.extract_strided_slice %9 {offsets = [0, 0], sizes = [272, 128], strides = [1, 1]} : vector<336x128xbf16> to vector<272x128xbf16>
    %c0_2 = arith.constant 0 : index
    %c0_3 = arith.constant 0 : index
    %c0_4 = arith.constant 0 : index
    %11 = vector.load %arg2[%c0_2, %c0_3, %c0_4] : memref<5x128x128xbf16, #tpu.memory_space<vmem>>, vector<1x128x128xbf16>
    %12 = vector.shape_cast %11 : vector<1x128x128xbf16> to vector<128x128xbf16>
    %cst = arith.constant dense<0.000000e+00> : vector<272x128xf32>
    %13 = tpu.matmul %10, %12, %cst {dimension_numbers = #tpu.dot_dimension_numbers<[1], [0], [0], [1], [0, 0, 1, 1], [], []>} : vector<272x128xbf16>, vector<128x128xbf16>, vector<272x128xf32> -> vector<272x128xf32>
    %14 = vector.extract_strided_slice %9 {offsets = [16, 0], sizes = [272, 128], strides = [1, 1]} : vector<336x128xbf16> to vector<272x128xbf16>
    %c1 = arith.constant 1 : index
    %c0_5 = arith.constant 0 : index
    %c0_6 = arith.constant 0 : index
    %15 = vector.load %arg2[%c1, %c0_5, %c0_6] : memref<5x128x128xbf16, #tpu.memory_space<vmem>>, vector<1x128x128xbf16>
    %16 = vector.shape_cast %15 : vector<1x128x128xbf16> to vector<128x128xbf16>
    %cst_7 = arith.constant dense<0.000000e+00> : vector<272x128xf32>
    %17 = tpu.matmul %14, %16, %cst_7 {dimension_numbers = #tpu.dot_dimension_numbers<[1], [0], [0], [1], [0, 0, 1, 1], [], []>} : vector<272x128xbf16>, vector<128x128xbf16>, vector<272x128xf32> -> vector<272x128xf32>
    %18 = arith.addf %13, %17 : vector<272x128xf32>
    %19 = vector.extract_strided_slice %9 {offsets = [32, 0], sizes = [272, 128], strides = [1, 1]} : vector<336x128xbf16> to vector<272x128xbf16>
    %c2 = arith.constant 2 : index
    %c0_8 = arith.constant 0 : index
    %c0_9 = arith.constant 0 : index
    %20 = vector.load %arg2[%c2, %c0_8, %c0_9] : memref<5x128x128xbf16, #tpu.memory_space<vmem>>, vector<1x128x128xbf16>
    %21 = vector.shape_cast %20 : vector<1x128x128xbf16> to vector<128x128xbf16>
    %cst_10 = arith.constant dense<0.000000e+00> : vector<272x128xf32>
    %22 = tpu.matmul %19, %21, %cst_10 {dimension_numbers = #tpu.dot_dimension_numbers<[1], [0], [0], [1], [0, 0, 1, 1], [], []>} : vector<272x128xbf16>, vector<128x128xbf16>, vector<272x128xf32> -> vector<272x128xf32>
    %23 = arith.addf %18, %22 : vector<272x128xf32>
    %24 = vector.extract_strided_slice %9 {offsets = [48, 0], sizes = [272, 128], strides = [1, 1]} : vector<336x128xbf16> to vector<272x128xbf16>
    %c3 = arith.constant 3 : index
    %c0_11 = arith.constant 0 : index
    %c0_12 = arith.constant 0 : index
    %25 = vector.load %arg2[%c3, %c0_11, %c0_12] : memref<5x128x128xbf16, #tpu.memory_space<vmem>>, vector<1x128x128xbf16>
    %26 = vector.shape_cast %25 : vector<1x128x128xbf16> to vector<128x128xbf16>
    %cst_13 = arith.constant dense<0.000000e+00> : vector<272x128xf32>
    %27 = tpu.matmul %24, %26, %cst_13 {dimension_numbers = #tpu.dot_dimension_numbers<[1], [0], [0], [1], [0, 0, 1, 1], [], []>} : vector<272x128xbf16>, vector<128x128xbf16>, vector<272x128xf32> -> vector<272x128xf32>
    %28 = arith.addf %23, %27 : vector<272x128xf32>
    %29 = vector.extract_strided_slice %9 {offsets = [64, 0], sizes = [272, 128], strides = [1, 1]} : vector<336x128xbf16> to vector<272x128xbf16>
    %c4 = arith.constant 4 : index
    %c0_14 = arith.constant 0 : index
    %c0_15 = arith.constant 0 : index
    %30 = vector.load %arg2[%c4, %c0_14, %c0_15] : memref<5x128x128xbf16, #tpu.memory_space<vmem>>, vector<1x128x128xbf16>
    %31 = vector.shape_cast %30 : vector<1x128x128xbf16> to vector<128x128xbf16>
    %cst_16 = arith.constant dense<0.000000e+00> : vector<272x128xf32>
    %32 = tpu.matmul %29, %31, %cst_16 {dimension_numbers = #tpu.dot_dimension_numbers<[1], [0], [0], [1], [0, 0, 1, 1], [], []>} : vector<272x128xbf16>, vector<128x128xbf16>, vector<272x128xf32> -> vector<272x128xf32>
    %33 = arith.addf %28, %32 : vector<272x128xf32>
    %34 = vector.shape_cast %33 : vector<272x128xf32> to vector<17x16x128xf32>
    %cst_17 = arith.constant dense<0xFF800000> : vector<16x128xf32>
    %35 = vector.multi_reduction <maximumf>, %34, %cst_17 [0] : vector<17x16x128xf32> to vector<16x128xf32>
    %c0_18 = arith.constant 0 : index
    %c0_19 = arith.constant 0 : index
    %36 = vector.load %arg3[%c0_18, %c0_19] : memref<1x128xf32, #tpu.memory_space<vmem>>, vector<1x128xf32>
    %37 = vector.broadcast %36 : vector<1x128xf32> to vector<16x128xf32>
    %38 = arith.addf %35, %37 : vector<16x128xf32>
    %cst_20 = arith.constant 0.000000e+00 : f32
    %39 = vector.broadcast %cst_20 : f32 to vector<16x128xf32>
    %40 = arith.maximumf %38, %39 : vector<16x128xf32>
    %41 = arith.truncf %40 : vector<16x128xf32> to vector<16x128xbf16>
    %c0_21 = arith.constant 0 : index
    %c0_22 = arith.constant 0 : index
    %42 = vector.load %arg4[%c0_21, %c0_22] : memref<128x256xbf16, #tpu.memory_space<vmem>>, vector<128x256xbf16>
    %cst_23 = arith.constant dense<0.000000e+00> : vector<16x256xf32>
    %43 = tpu.matmul %41, %42, %cst_23 {dimension_numbers = #tpu.dot_dimension_numbers<[1], [0], [0], [1], [0, 0, 1, 1], [], []>} : vector<16x128xbf16>, vector<128x256xbf16>, vector<16x256xf32> -> vector<16x256xf32>
    %c0_24 = arith.constant 0 : index
    %c0_25 = arith.constant 0 : index
    %44 = vector.load %arg5[%c0_24, %c0_25] : memref<1x256xf32, #tpu.memory_space<vmem>>, vector<1x256xf32>
    %45 = vector.broadcast %44 : vector<1x256xf32> to vector<16x256xf32>
    %46 = arith.addf %43, %45 : vector<16x256xf32>
    %47 = vector.extract_strided_slice %46 {offsets = [0, 0], sizes = [16, 128], strides = [1, 1]} : vector<16x256xf32> to vector<16x128xf32>
    %cst_26 = arith.constant 0.000000e+00 : f32
    %48 = vector.broadcast %cst_26 : f32 to vector<16x128xf32>
    %49 = arith.maximumf %47, %48 : vector<16x128xf32>
    %50 = vector.extract_strided_slice %46 {offsets = [0, 128], sizes = [16, 128], strides = [1, 1]} : vector<16x256xf32> to vector<16x128xf32>
    %51 = arith.negf %50 : vector<16x128xf32>
    %52 = math.exp %51 : vector<16x128xf32>
    %cst_27 = arith.constant 1.000000e+00 : f32
    %53 = vector.broadcast %cst_27 : f32 to vector<16x128xf32>
    %54 = arith.addf %53, %52 : vector<16x128xf32>
    %55 = arith.divf %53, %54 : vector<16x128xf32>
    %56 = arith.mulf %55, %49 : vector<16x128xf32>
    %cst_28 = arith.constant 1.000000e+00 : f32
    %57 = vector.broadcast %cst_28 : f32 to vector<16x128xf32>
    %58 = arith.subf %57, %55 : vector<16x128xf32>
    %59 = arith.mulf %58, %40 : vector<16x128xf32>
    %60 = arith.addf %56, %59 : vector<16x128xf32>
    %c0_29 = arith.constant 0 : index
    %c0_30 = arith.constant 0 : index
    %61 = vector.load %arg6[%c0_29, %c0_30] : memref<16x128xf32, #tpu.memory_space<vmem>>, vector<16x128xf32>
    tpu.vector_store %arg6[%c0_29, %c0_30], %60 {strides = array<i32>} : memref<16x128xf32, #tpu.memory_space<vmem>>, vector<16x128xf32>,
    return
  }
  func.func @transform_0(%arg0: i32) -> (i32, i32, i32) {
    %c0_i32 = arith.constant 0 : i32
    %c0_i32_0 = arith.constant 0 : i32
    %c0_i32_1 = arith.constant 0 : i32
    return %arg0, %c0_i32, %c0_i32_0 : i32, i32, i32
  }
  func.func @transform_1(%arg0: i32) -> (i32, i32, i32) {
    %c0_i32 = arith.constant 0 : i32
    %c0_i32_0 = arith.constant 0 : i32
    %c0_i32_1 = arith.constant 0 : i32
    %c0_i32_2 = arith.constant 0 : i32
    return %c0_i32, %c0_i32_0, %c0_i32_1 : i32, i32, i32
  }
  func.func @transform_2(%arg0: i32) -> (i32, i32) {
    %c0_i32 = arith.constant 0 : i32
    %c0_i32_0 = arith.constant 0 : i32
    %c0_i32_1 = arith.constant 0 : i32
    return %c0_i32, %c0_i32_0 : i32, i32
  }
  func.func @transform_3(%arg0: i32) -> (i32, i32) {
    %c0_i32 = arith.constant 0 : i32
    %c0_i32_0 = arith.constant 0 : i32
    %c0_i32_1 = arith.constant 0 : i32
    return %c0_i32, %c0_i32_0 : i32, i32
  }
  func.func @transform_4(%arg0: i32) -> (i32, i32) {
    %c0_i32 = arith.constant 0 : i32
    %c0_i32_0 = arith.constant 0 : i32
    %c0_i32_1 = arith.constant 0 : i32
    return %c0_i32, %c0_i32_0 : i32, i32
  }
  func.func @transform_5(%arg0: i32) -> (i32, i32) {
    %c0_i32 = arith.constant 0 : i32
    %c0_i32_0 = arith.constant 0 : i32
    return %arg0, %c0_i32 : i32, i32
  }
}

</mosaic_0001>

<bundles_post_ra>
// kernel: model_embeddings_forward.1
= control target key start
LH: loop header
LB: loop body
LE: loop exit
PB: predicated region body
PF: predicated region fallthrough
CT: control target
= control target key end

     0   :  { %10 = vsyncpa [#allocation3], 0  ;;  %s3200_s18 = smov 0   ;;  %s4150_s0 = inlined_call_operand.vmem [shape: s32[2,21,16], index: 0, kind: input, shape index: {}]   ;;  %s4151_s1 = inlined_call_operand.hbm [shape: bf16[5,128,128], index: 1, kind: input, shape index: {}]   ;;  %s4152_s2 = inlined_call_operand.vmem [shape: f32[1,128], index: 2, kind: input, shape index: {}]   ;;  %s4153_s3 = inlined_call_operand.vmem [shape: bf16[128,256], index: 3, kind: input, shape index: {}]   ;;  %s4154_s4 = inlined_call_operand.vmem [shape: f32[1,256], index: 4, kind: input, shape index: {}]   ;;  %s4155_s5 = inlined_call_operand.vmem [shape: f32[32,128], index: 5, kind: output, shape index: {}]  }
   0x1 LB: > { %s3206_s19 = sadd.s32 4294967295, %s3161_s18   ;;  %p2185_p0 = scmp.ge.s32.totalorder %s3161_s18, 1  ;;  %s3161_s18 = sphi %s3200_s18, %s16_s18  }
   0x2   : > { %p157_p1 = scmp.lt.s32.totalorder %s3161_s18, 3  ;;  %s3163_s20 = smov [#allocation2]  }
   0x3   : > { %s169_s21 = sshll.u32 %s3163_s20, 4  ;;  %p3036_p3 = scmp.eq.s32.totalorder %s3206_s19, 0  ;;  %s170_s21 = int_to_ptr.vmem [resolvable:$true] %s169_s21 }
   0x4   : > { %p3210_p2 = pnand %p2185_p0, %p157_p1  ;;  %s3136_s23 = scalar_lea.vmem %s170_s21, 5120 }
   0x5   : > { %p3137_p7 = scmp.ne.s32.totalorder %s170_s21, %s3136_s23  ;;  %p3144_p10 = scmp.lt.s32.totalorder %s170_s21, %s170_s21 }
   0x6   : > { %p3032_p4 = pneg %p3210_p2  ;;  %p3145_p11 = scmp.lt.s32.totalorder %s3136_s23, %s3136_s23 }
   0x8   : > { %p3033_p5 = pnand %p3036_p3, %p3032_p4  ;;  %p3146_p12 = por %p3145_p11, %p3144_p10 }
   0xa   : > { %p3127_p6 = pneg %p3033_p5 }
   0xc   : > { %p3139_p8 = pnand %p3137_p7, %p3127_p6 }
   0xe   : > { %p3140_p9 = pneg %p3139_p8 }
  0x10   : > { %p3147_p13 = pnand %p3146_p12, %p3140_p9 }
  0x12   : > { %3150 = shalt.err (!%p3147_p13)
}
  0x13   : > { %s3164_s24 = smov 64   ;;  %s3165_s25 = smov 4  }
  0x14   : > { %3035 = dma.hbm_to_vmem [thread:$0]  (!%p3033_p5), %s4151_s1, 5120, %s170_s21, [#allocation3], %s3164_s24, %s3164_s24, %s3165_s25  }
  0x15   : > { %202 = sbr.rel (%p3210_p2) target bundleno = 944 (0x3b0), region = 40 }
  0x1a   : > { %3156 = dma.done.wait (%p3036_p3), [#allocation3], 5120  }
  0x1b   : > { %3158 = vsyncadd (%p3036_p3), [#allocation3], 4294962176  ;;  %p230_p0 = scmp.lt.s32.totalorder %s3206_s19, 1  ;;  %v245_v0 = vlaneseq  ;;  %v3166_v1 = vmov 0.0   ;;  %vm3167_vm0 = vmmov 0   ;;  %v3053_v9 = vld [vmem:[#allocation2 + $0x78] sm:$0xff]  }
  0x1c   : > { %2591 = vmatprep.subr.bf16.mxu0 %v3166_v1  ;;  %3011 = vmatprep.subr.bf16.mxu1 %v3166_v1  ;;  %v3054_v10 = vld [vmem:[#allocation2 + $0x70] sm:$0xff]   ;;  %v3055_v13 = vld [vmem:[#allocation2 + $0x68] sm:$0xff]   ;;  %v3056_v15 = vld [vmem:[#allocation2 + $0x60] sm:$0xff]   ;;  %v3168_v50 = vmov 1.0|1.0   ;;  %v4180_v59 = vmov 0 }
  0x1d   : > { %s231_s28 = scalar_select %p230_p0, %s3206_s19, 1  ;;  %v3233_v2 = vshrl.u32 %v245_v0, 7  ;;  %2607 = vmatprep.mubr.msk.bf16.mxu0 %vm3167_vm0, %v3166_v1  ;;  %2643 = vmatprep.mubr.msk.bf16.mxu1 %vm3167_vm0, %v3166_v1  ;;  %v3057_v19 = vld [vmem:[#allocation2 + $0x58] sm:$0xff]   ;;  %v3058_v21 = vld [vmem:[#allocation2 + $0x50] sm:$0xff]   ;;  %v3059_v23 = vld [vmem:[#allocation2 + $0x48] sm:$0xff]   ;;  %v3320_v43 = vand.u32 127, %v245_v0 }
  0x1e   : > { %2592 = vmatpush3.bf16.msra.mxu0 %v3053_v9  ;;  %3019 = vmatpush3.bf16.msra.mxu1 %v3053_v9  ;;  %v3060_v25 = vld [vmem:[#allocation2 + $0x40] sm:$0xff]   ;;  %v3062_v46 = vld [vmem:[#allocation2 + $0x38] sm:$0xff]   ;;  %v3064_v53 = vld [vmem:[#allocation2 + $0x30] sm:$0xff]   ;;  %s2191_s23 = sshll.u32 %s3206_s19, 1 }
  0x1f   : > { %s3027_s29 = smul.u32 24, %s231_s28  ;;  %v3240_v3 = vsub.s32 2, %v3233_v2  ;;  %v3243_v4 = vsub.s32 1, %v3233_v2  ;;  %2593 = vmatprep.subr.bf16.mxu0 %v3166_v1  ;;  %3012 = vmatprep.subr.bf16.mxu1 %v3166_v1  ;;  %v3265_v12 = vsub.s32 3, %v3233_v2  ;;  %v3272_v16 = vsub.s32 4, %v3233_v2  ;;  %v3061_v47 = vld [vmem:[#allocation2 + $0xb8] sm:$0xff]  }
  0x20   : > { %v302_v17 = vsub.s32 5, %v3233_v2  ;;  %v313_v27 = vsub.s32 6, %v3233_v2  ;;  %v324_v30 = vsub.s32 7, %v3233_v2  ;;  %v3302_v33 = vsub.s32 0, %v3233_v2  ;;  %v3063_v54 = vld [vmem:[#allocation2 + $0xb0] sm:$0xff]   ;;  %v3065_v58 = vld [vmem:[#allocation2 + $0xa8] sm:$0xff]  }
  0x21   : > { %s3248_s7 = scalar_lea.vmem %s4150_s0, %s3027_s29  ;;  %v3066_v60 = vld [vmem:[#allocation2 + $0x28] sm:$0xff]   ;;  %v3067_v63 = vld [vmem:[#allocation2 + $0xa0] sm:$0xff]   ;;  %v3087_v57 = vld [vmem:[#allocation2 + $0xd0] sm:$0xff]   ;;  %p236_p1 = scmp.lt.s32.totalorder %s2191_s23, 3 }
  0x22   : > { %v3251_v5 = vld [vmem:[%s3248_s7 + $0x8] sm:$0xff]  ;;  %v3254_v6 = vld [vmem:[%s3248_s7] sm:$0xff]  ;;  %2594 = vmatpush3.bf16.msra.mxu0 %v3054_v10  ;;  %3020 = vmatpush3.bf16.msra.mxu1 %v3054_v10  ;;  %v3305_v34 = vld [vmem:[%s3248_s7 + $0x10] sm:$0x1f] }
  0x23   : > { %v358_v7 = vrot.slane %v3251_v5, %v3240_v3  ;;  %v259_v8 = vrot.slane %v3254_v6, %v3243_v4  ;;  %v270_v11 = vrot.slane %v3254_v6, %v3240_v3  ;;  %2595 = vmatprep.subr.bf16.mxu0 %v3166_v1  ;;  %3013 = vmatprep.subr.bf16.mxu1 %v3166_v1  ;;  %v3068_v0 = vld [vmem:[#allocation2 + $0x20] sm:$0xff]   ;;  %v3082_v49 = vld [vmem:[#allocation2 + $0x128] sm:$0xff]   ;;  %s4221_s23 = smov (!%p236_p1, %s2191_s23), 3 }
  0x24   : > { %v369_v14 = vrot.slane %v3251_v5, %v3265_v12  ;;  %v281_v18 = vrot.slane %v3254_v6, %v3265_v12  ;;  %v380_v20 = vrot.slane %v3251_v5, %v3272_v16  ;;  %v292_v22 = vrot.slane %v3254_v6, %v3272_v16  ;;  %s2192_s24 = sshll.u32 %s4221_s23, 3 }
  0x25   : > { %360 = vbcast.lane.b32.xlu1 %v358_v7, 256  ;;  %261 = vbcast.lane.b32.xlu0 %v259_v8, 256  ;;  %v391_v24 = vrot.slane %v3251_v5, %v302_v17  ;;  %v303_v26 = vrot.slane %v3254_v6, %v302_v17  ;;  %v402_v28 = vrot.slane %v3251_v5, %v313_v27  ;;  %s239_s27 = scalar_lea.vmem %s4155_s5, %s2192_s24 }
  0x26   : > { %2596 = vmatpush3.bf16.msra.mxu0 %v3055_v13  ;;  %3021 = vmatpush3.bf16.msra.mxu1 %v3055_v13  ;;  %v314_v29 = vrot.slane %v3254_v6, %v313_v27  ;;  %v413_v31 = vrot.slane %v3251_v5, %v324_v30  ;;  %v325_v32 = vrot.slane %v3254_v6, %v324_v30  ;;  %v3072_v13 = vld [vmem:[#allocation2 + $0x10] sm:$0xff]  }
  0x27   : > { %2597 = vmatprep.subr.bf16.mxu0 %v3166_v1  ;;  %3014 = vmatprep.subr.bf16.mxu1 %v3166_v1  ;;  %v424_v35 = vrot.slane %v3305_v34, %v3302_v33  ;;  %v336_v36 = vrot.slane %v3251_v5, %v3302_v33  ;;  %v435_v37 = vrot.slane %v3305_v34, %v3243_v4 }
  0x28   : > { %v347_v38 = vrot.slane %v3251_v5, %v3243_v4  ;;  %v248_v39 = vrot.slane %v3254_v6, %v3302_v33  ;;  %v446_v40 = vrot.slane %v3305_v34, %v3240_v3  ;;  %v3069_v6 = vld [vmem:[#allocation2 + $0x98] sm:$0xff]  }
  0x29   : > { %364 = vbcast.lane.b32.xlu1 %v358_v7, 264  ;;  %265 = vbcast.lane.b32.xlu0 %v259_v8, 264  ;;  %v4184_v7 = vmov 0  ;;  %v3070_v8 = vld [vmem:[#allocation2 + $0x18] sm:$0xff]  }
  0x2a   : > { %2598 = vmatpush3.bf16.msra.mxu0 %v3056_v15  ;;  %3022 = vmatpush3.bf16.msra.mxu1 %v3056_v15 }
  0x2b   : > { %2599 = vmatprep.subr.bf16.mxu0 %v3166_v1  ;;  %3015 = vmatprep.subr.bf16.mxu1 %v3166_v1 }
  0x2d   : > { %276 = vbcast.lane.b32.xlu1 %v270_v11, 264  ;;  %272 = vbcast.lane.b32.xlu0 %v270_v11, 256  ;;  %v3071_v11 = vld [vmem:[#allocation2 + $0x90] sm:$0xff]  }
  0x2e   : > { %2600 = vmatpush3.bf16.msra.mxu0 %v3057_v19  ;;  %3023 = vmatpush3.bf16.msra.mxu1 %v3057_v19  ;;  %v4188_v19 = vmov 0 }
  0x2f   : > { %2601 = vmatprep.subr.bf16.mxu0 %v3166_v1  ;;  %3016 = vmatprep.subr.bf16.mxu1 %v3166_v1 }
  0x31   : > { %375 = vbcast.lane.b32.xlu1 %v369_v14, 264  ;;  %371 = vbcast.lane.b32.xlu0 %v369_v14, 256 }
  0x32   : > { %2602 = vmatpush3.bf16.msra.mxu0 %v3058_v21  ;;  %3024 = vmatpush3.bf16.msra.mxu1 %v3058_v21 }
  0x33   : > { %2603 = vmatprep.subr.bf16.mxu0 %v3166_v1  ;;  %3017 = vmatprep.subr.bf16.mxu1 %v3166_v1 }
  0x35   : > { %287 = vbcast.lane.b32.xlu1 %v281_v18, 264  ;;  %283 = vbcast.lane.b32.xlu0 %v281_v18, 256  ;;  %v3074_v18 = vld [vmem:[#allocation2 + $0x88] sm:$0xff]  }
  0x36   : > { %2604 = vmatpush3.bf16.msra.mxu0 %v3059_v23  ;;  %3025 = vmatpush3.bf16.msra.mxu1 %v3059_v23  ;;  %v3076_v23 = vld [vmem:[#allocation2 + $0x80] sm:$0xff]  }
  0x37   : > { %2605 = vmatprep.subr.bf16.mxu0 %v3166_v1  ;;  %3018 = vmatprep.subr.bf16.mxu1 %v3166_v1 }
  0x39   : > { %386 = vbcast.lane.b32.xlu1 %v380_v20, 264  ;;  %382 = vbcast.lane.b32.xlu0 %v380_v20, 256  ;;  %v3073_v20 = vld [vmem:[#allocation2 + $0x8] sm:$0xff]  }
  0x3a   : > { %2606 = vmatpush3.bf16.msra.mxu0 %v3060_v25  ;;  %3026 = vmatpush3.bf16.msra.mxu1 %v3060_v25 }
  0x3b   : > { %2759 = vmatprep.subr.bf16.mxu0 %v3166_v1  ;;  %2675 = vmatprep.subr.bf16.mxu1 %v3166_v1 }
  0x3d   : > { %298 = vbcast.lane.b32.xlu1 %v292_v22, 264  ;;  %294 = vbcast.lane.b32.xlu0 %v292_v22, 256 }
  0x41   : > { %397 = vbcast.lane.b32.xlu1 %v391_v24, 264  ;;  %393 = vbcast.lane.b32.xlu0 %v391_v24, 256  ;;  %v3075_v24 = vld [vmem:[#allocation2] sm:$0xff]  }
  0x45   : > { %309 = vbcast.lane.b32.xlu1 %v303_v26, 264  ;;  %305 = vbcast.lane.b32.xlu0 %v303_v26, 256 }
  0x49   : > { %408 = vbcast.lane.b32.xlu1 %v402_v28, 264  ;;  %404 = vbcast.lane.b32.xlu0 %v402_v28, 256  ;;  %v4192_v28 = vmov 0 }
  0x4d   : > { %320 = vbcast.lane.b32.xlu1 %v314_v29, 264  ;;  %316 = vbcast.lane.b32.xlu0 %v314_v29, 256 }
  0x51   : > { %419 = vbcast.lane.b32.xlu1 %v413_v31, 264  ;;  %415 = vbcast.lane.b32.xlu0 %v413_v31, 256 }
  0x55   : > { %331 = vbcast.lane.b32.xlu1 %v325_v32, 264  ;;  %327 = vbcast.lane.b32.xlu0 %v325_v32, 256 }
  0x59   : > { %430 = vbcast.lane.b32.xlu1 %v424_v35, 264  ;;  %426 = vbcast.lane.b32.xlu0 %v424_v35, 256 }
  0x5d   : > { %342 = vbcast.lane.b32.xlu1 %v336_v36, 264  ;;  %338 = vbcast.lane.b32.xlu0 %v336_v36, 256  ;;  %v4196_v36 = vmov 0 }
  0x61   : > { %441 = vbcast.lane.b32.xlu1 %v435_v37, 264  ;;  %437 = vbcast.lane.b32.xlu0 %v435_v37, 256 }
  0x65   : > { %353 = vbcast.lane.b32.xlu1 %v347_v38, 264  ;;  %349 = vbcast.lane.b32.xlu0 %v347_v38, 256 }
  0x69   : > { %254 = vbcast.lane.b32.xlu1 %v248_v39, 264  ;;  %250 = vbcast.lane.b32.xlu0 %v248_v39, 256 }
  0x6d   : > { %452 = vbcast.lane.b32.xlu1 %v446_v40, 264  ;;  %448 = vbcast.lane.b32.xlu0 %v446_v40, 256 }
  0x97   : > { %v361_v41 = vpop.permute.xlu1 %360  ;;  %v262_v42 = vpop.permute.xlu0 %261 }
  0x98   : > { %vm498_vm1 = vcmp.eq.s32.totalorder %v3320_v43, %v361_v41  ;;  %vm480_vm4 = vcmp.eq.s32.totalorder %v3320_v43, %v262_v42  ;;  %v4200_v42 = vmov 0 }
  0x9b   : > { %v365_v44 = vpop.permute.xlu1 %364  ;;  %v266_v45 = vpop.permute.xlu0 %265 }
  0x9c   : > { %vm499_vm2 = vcmp.eq.s32.totalorder %v3320_v43, %v365_v44  ;;  %vm481_vm3 = vcmp.eq.s32.totalorder %v3320_v43, %v266_v45 }
  0x9d   : > { %vm3326_vm5 = vmpackc.low %vm499_vm2, %vm498_vm1 }
  0x9e   : > { %vm3330_vm6 = vmpackc.low %vm481_vm3, %vm480_vm4  ;;  %2644 = vmatmul.mubr.msk.bf16.vlgmr.msra.gmra.mxu1 %vm3326_vm5, %v3168_v50 }
  0x9f   : > { %2608 = vmatmul.mubr.msk.bf16.vlgmr.msra.gmra.mxu0 %vm3330_vm6, %v3168_v50  ;;  %v277_v51 = vpop.permute.xlu1 %276  ;;  %v273_v52 = vpop.permute.xlu0 %272  ;;  %2676 = vmatpush3.bf16.msra.mxu1 %v3062_v46 }
  0xa0   : > { %2760 = vmatpush3.bf16.msra.mxu0 %v3061_v47  ;;  %2611 = vmatprep.mubr.msk.bf16.mxu0 %vm3167_vm0, %v3166_v1  ;;  %vm483_vm7 = vcmp.eq.s32.totalorder %v3320_v43, %v277_v51  ;;  %vm482_vm8 = vcmp.eq.s32.totalorder %v3320_v43, %v273_v52  ;;  %v4204_v52 = vmov 0 }
  0xa1   : > { %2647 = vmatprep.mubr.msk.bf16.mxu1 %vm3167_vm0, %v3166_v1  ;;  %2761 = vmatprep.subr.bf16.mxu0 %v3166_v1  ;;  %vm3348_vm9 = vmpackc.low %vm483_vm7, %vm482_vm8 }
  0xa2   : > { %2677 = vmatprep.subr.bf16.mxu1 %v3166_v1 }
  0xa3   : > { %v376_v55 = vpop.permute.xlu1 %375  ;;  %v372_v56 = vpop.permute.xlu0 %371  ;;  %2678 = vmatpush3.bf16.msra.mxu1 %v3064_v53 }
  0xa4   : > { %vm501_vm10 = vcmp.eq.s32.totalorder %v3320_v43, %v376_v55  ;;  %vm500_vm11 = vcmp.eq.s32.totalorder %v3320_v43, %v372_v56  ;;  %2762 = vmatpush3.bf16.msra.mxu0 %v3063_v54  ;;  %2679 = vmatprep.subr.bf16.mxu1 %v3166_v1 }
  0xa5   : > { %vm3355_vm12 = vmpackc.low %vm501_vm10, %vm500_vm11  ;;  %2763 = vmatprep.subr.bf16.mxu0 %v3166_v1 }
  0xa6   : > { %v4181_v59 = vsel %vm3355_vm12, 4294967295, %v4180_v59  ;;  %2648 = vmatmul.mubr.msk.bf16.gmra.mxu1 %vm3355_vm12, %v3168_v50 }
  0xa7   : > { %2612 = vmatmul.mubr.msk.bf16.gmra.mxu0 %vm3348_vm9, %v3168_v50  ;;  %v288_v61 = vpop.permute.xlu1 %287  ;;  %v284_v62 = vpop.permute.xlu0 %283  ;;  %2651 = vmatprep.mubr.msk.bf16.mxu1 %vm3167_vm0, %v3166_v1 }
  0xa8   : > { %2615 = vmatprep.mubr.msk.bf16.mxu0 %vm3167_vm0, %v3166_v1  ;;  %2764 = vmatpush3.bf16.msra.mxu0 %v3065_v58  ;;  %vm485_vm13 = vcmp.eq.s32.totalorder %v3320_v43, %v288_v61  ;;  %vm484_vm14 = vcmp.eq.s32.totalorder %v3320_v43, %v284_v62  ;;  %v3077_v58 = vld [vmem:[#allocation2 + $0xf8] sm:$0xff]   ;;  %v3079_v61 = vld [vmem:[#allocation2 + $0xf0] sm:$0xff]  }
  0xa9   : > { %2680 = vmatpush3.bf16.msra.mxu1 %v3066_v60  ;;  %2765 = vmatprep.subr.bf16.mxu0 %v3166_v1  ;;  %vm3374_vm15 = vmpackc.low %vm485_vm13, %vm484_vm14  ;;  %v3078_v62 = vld [vmem:[#allocation2 + $0x138] sm:$0xff]  }
  0xaa   : > { %2681 = vmatprep.subr.bf16.mxu1 %v3166_v1 }
  0xab   : > { %v387_v2 = vpop.permute.xlu1 %386  ;;  %v383_v3 = vpop.permute.xlu0 %382 }
  0xac   : > { %vm503_vm1 = vcmp.eq.s32.totalorder %v3320_v43, %v387_v2  ;;  %vm502_vm2 = vcmp.eq.s32.totalorder %v3320_v43, %v383_v3  ;;  %2766 = vmatpush3.bf16.msra.mxu0 %v3067_v63  ;;  %v3081_v63 = vld [vmem:[#allocation2 + $0xe8] sm:$0xff]   ;;  %v3083_v2 = vld [vmem:[#allocation2 + $0xe0] sm:$0xff]   ;;  %v3085_v3 = vld [vmem:[#allocation2 + $0xd8] sm:$0xff]  }
  0xad   : > { %vm3380_vm3 = vmpackc.low %vm503_vm1, %vm502_vm2  ;;  %2682 = vmatpush3.bf16.msra.mxu1 %v3068_v0  ;;  %2767 = vmatprep.subr.bf16.mxu0 %v3166_v1  ;;  %v3080_v0 = vld [vmem:[#allocation2 + $0x130] sm:$0xff]  }
  0xae   : > { %v4185_v7 = vsel %vm3380_vm3, 4294967295, %v4184_v7  ;;  %2652 = vmatmul.mubr.msk.bf16.gmra.mxu1 %vm3380_vm3, %v3168_v50  ;;  %2683 = vmatprep.subr.bf16.mxu1 %v3166_v1 }
  0xaf   : > { %2616 = vmatmul.mubr.msk.bf16.gmra.mxu0 %vm3374_vm15, %v3168_v50  ;;  %v299_v9 = vpop.permute.xlu1 %298  ;;  %v295_v10 = vpop.permute.xlu0 %294  ;;  %2655 = vmatprep.mubr.msk.bf16.mxu1 %vm3167_vm0, %v3166_v1 }
  0xb0   : > { %2619 = vmatprep.mubr.msk.bf16.mxu0 %vm3167_vm0, %v3166_v1  ;;  %2768 = vmatpush3.bf16.msra.mxu0 %v3069_v6  ;;  %vm487_vm4 = vcmp.eq.s32.totalorder %v3320_v43, %v299_v9  ;;  %vm486_vm7 = vcmp.eq.s32.totalorder %v3320_v43, %v295_v10  ;;  %v3084_v6 = vld [vmem:[#allocation2 + $0x120] sm:$0xff]   ;;  %v3086_v9 = vld [vmem:[#allocation2 + $0x118] sm:$0xff]   ;;  %v3089_v10 = vld [vmem:[#allocation2 + $0xc8] sm:$0xff]  }
  0xb1   : > { %2684 = vmatpush3.bf16.msra.mxu1 %v3070_v8  ;;  %2769 = vmatprep.subr.bf16.mxu0 %v3166_v1  ;;  %vm3400_vm8 = vmpackc.low %vm487_vm4, %vm486_vm7  ;;  %v457_v8 = vrot.slane %v3305_v34, %v3265_v12  ;;  %v3088_v12 = vld [vmem:[#allocation2 + $0x110] sm:$0xff]  }
  0xb2   : > { %2685 = vmatprep.subr.bf16.mxu1 %v3166_v1 }
  0xb3   : > { %v398_v14 = vpop.permute.xlu1 %397  ;;  %v394_v15 = vpop.permute.xlu0 %393  ;;  %463 = vbcast.lane.b32.xlu1 %v457_v8, 264  ;;  %459 = vbcast.lane.b32.xlu0 %v457_v8, 256 }
  0xb4   : > { %vm505_vm10 = vcmp.eq.s32.totalorder %v3320_v43, %v398_v14  ;;  %vm504_vm11 = vcmp.eq.s32.totalorder %v3320_v43, %v394_v15  ;;  %2770 = vmatpush3.bf16.msra.mxu0 %v3071_v11  ;;  %v468_v11 = vrot.slane %v3305_v34, %v3272_v16  ;;  %v3090_v14 = vld [vmem:[#allocation2 + $0x108] sm:$0xff]   ;;  %v3092_v16 = vld [vmem:[#allocation2 + $0x100] sm:$0xff]  }
  0xb5   : > { %vm3406_vm13 = vmpackc.low %vm505_vm10, %vm504_vm11  ;;  %2686 = vmatpush3.bf16.msra.mxu1 %v3072_v13  ;;  %2771 = vmatprep.subr.bf16.mxu0 %v3166_v1  ;;  %v3091_v13 = vld [vmem:[#allocation2 + $0xc0] sm:$0xff]  }
  0xb6   : > { %v4189_v19 = vsel %vm3406_vm13, 4294967295, %v4188_v19  ;;  %2656 = vmatmul.mubr.msk.bf16.gmra.mxu1 %vm3406_vm13, %v3168_v50  ;;  %2687 = vmatprep.subr.bf16.mxu1 %v3166_v1 }
  0xb7   : > { %2620 = vmatmul.mubr.msk.bf16.gmra.mxu0 %vm3400_vm8, %v3168_v50  ;;  %v310_v21 = vpop.permute.xlu1 %309  ;;  %v306_v22 = vpop.permute.xlu0 %305  ;;  %2659 = vmatprep.mubr.msk.bf16.mxu1 %vm3167_vm0, %v3166_v1 }
  0xb8   : > { %2623 = vmatprep.mubr.msk.bf16.mxu0 %vm3167_vm0, %v3166_v1  ;;  %2772 = vmatpush3.bf16.msra.mxu0 %v3074_v18  ;;  %vm489_vm14 = vcmp.eq.s32.totalorder %v3320_v43, %v310_v21  ;;  %vm488_vm1 = vcmp.eq.s32.totalorder %v3320_v43, %v306_v22 }
  0xb9   : > { %2688 = vmatpush3.bf16.msra.mxu1 %v3073_v20  ;;  %2773 = vmatprep.subr.bf16.mxu0 %v3166_v1  ;;  %vm3426_vm2 = vmpackc.low %vm489_vm14, %vm488_vm1 }
  0xba   : > { %2689 = vmatprep.subr.bf16.mxu1 %v3166_v1  ;;  %474 = vbcast.lane.b32.xlu1 %v468_v11, 264 }
  0xbb   : > { %v409_v25 = vpop.permute.xlu1 %408  ;;  %v405_v26 = vpop.permute.xlu0 %404  ;;  %470 = vbcast.lane.b32.xlu0 %v468_v11, 256 }
  0xbc   : > { %vm507_vm4 = vcmp.eq.s32.totalorder %v3320_v43, %v409_v25  ;;  %vm506_vm7 = vcmp.eq.s32.totalorder %v3320_v43, %v405_v26  ;;  %2774 = vmatpush3.bf16.msra.mxu0 %v3076_v23 }
  0xbd   : > { %vm3432_vm10 = vmpackc.low %vm507_vm4, %vm506_vm7  ;;  %2690 = vmatpush3.bf16.msra.mxu1 %v3075_v24  ;;  %2927 = vmatprep.subr.bf16.mxu0 %v3166_v1 }
  0xbe   : > { %v4193_v28 = vsel %vm3432_vm10, 4294967295, %v4192_v28  ;;  %2660 = vmatmul.mubr.msk.bf16.gmra.mxu1 %vm3432_vm10, %v3168_v50  ;;  %2843 = vmatprep.subr.bf16.mxu1 %v3166_v1 }
  0xbf   : > { %2624 = vmatmul.mubr.msk.bf16.gmra.mxu0 %vm3426_vm2, %v3168_v50  ;;  %v321_v29 = vpop.permute.xlu1 %320  ;;  %v317_v30 = vpop.permute.xlu0 %316  ;;  %2663 = vmatprep.mubr.msk.bf16.mxu1 %vm3167_vm0, %v3166_v1 }
  0xc0   : > { %2627 = vmatprep.mubr.msk.bf16.mxu0 %vm3167_vm0, %v3166_v1  ;;  %vm491_vm11 = vcmp.eq.s32.totalorder %v3320_v43, %v321_v29  ;;  %vm490_vm14 = vcmp.eq.s32.totalorder %v3320_v43, %v317_v30 }
  0xc1   : > { %vm3450_vm1 = vmpackc.low %vm491_vm11, %vm490_vm14 }
  0xc3   : > { %v420_v31 = vpop.permute.xlu1 %419  ;;  %v416_v32 = vpop.permute.xlu0 %415 }
  0xc4   : > { %vm509_vm4 = vcmp.eq.s32.totalorder %v3320_v43, %v420_v31  ;;  %vm508_vm7 = vcmp.eq.s32.totalorder %v3320_v43, %v416_v32 }
  0xc5   : > { %vm3456_vm10 = vmpackc.low %vm509_vm4, %vm508_vm7 }
  0xc6   : > { %v4197_v36 = vsel %vm3456_vm10, 4294967295, %v4196_v36  ;;  %2664 = vmatmul.mubr.msk.bf16.gmra.mxu1 %vm3456_vm10, %v3168_v50 }
  0xc7   : > { %2628 = vmatmul.mubr.msk.bf16.gmra.mxu0 %vm3450_vm1, %v3168_v50  ;;  %v332_v37 = vpop.permute.xlu1 %331  ;;  %v328_v38 = vpop.permute.xlu0 %327  ;;  %2667 = vmatprep.mubr.msk.bf16.mxu1 %vm3167_vm0, %v3166_v1 }
  0xc8   : > { %2631 = vmatprep.mubr.msk.bf16.mxu0 %vm3167_vm0, %v3166_v1  ;;  %vm493_vm11 = vcmp.eq.s32.totalorder %v3320_v43, %v332_v37  ;;  %vm492_vm14 = vcmp.eq.s32.totalorder %v3320_v43, %v328_v38 }
  0xc9   : > { %vm3472_vm4 = vmpackc.low %vm493_vm11, %vm492_vm14 }
  0xcb   : > { %v431_v39 = vpop.permute.xlu1 %430  ;;  %v427_v40 = vpop.permute.xlu0 %426 }
  0xcc   : > { %vm511_vm7 = vcmp.eq.s32.totalorder %v3320_v43, %v431_v39  ;;  %vm510_vm10 = vcmp.eq.s32.totalorder %v3320_v43, %v427_v40 }
  0xcd   : > { %vm3478_vm13 = vmpackc.low %vm511_vm7, %vm510_vm10 }
  0xce   : > { %v4201_v42 = vsel %vm3478_vm13, 4294967295, %v4200_v42  ;;  %2668 = vmatmul.mubr.msk.bf16.gmra.mxu1 %vm3478_vm13, %v3168_v50 }
  0xcf   : > { %2632 = vmatmul.mubr.msk.bf16.gmra.mxu0 %vm3472_vm4, %v3168_v50  ;;  %v343_v44 = vpop.permute.xlu1 %342  ;;  %v339_v45 = vpop.permute.xlu0 %338  ;;  %2671 = vmatprep.mubr.msk.bf16.mxu1 %vm3167_vm0, %v3166_v1 }
  0xd0   : > { %2635 = vmatprep.mubr.msk.bf16.mxu0 %vm3167_vm0, %v3166_v1  ;;  %vm495_vm10 = vcmp.eq.s32.totalorder %v3320_v43, %v343_v44  ;;  %vm494_vm11 = vcmp.eq.s32.totalorder %v3320_v43, %v339_v45 }
  0xd1   : > { %vm3494_vm14 = vmpackc.low %vm495_vm10, %vm494_vm11 }
  0xd3   : > { %v442_v46 = vpop.permute.xlu1 %441  ;;  %v438_v47 = vpop.permute.xlu0 %437 }
  0xd4   : > { %vm513_vm7 = vcmp.eq.s32.totalorder %v3320_v43, %v442_v46  ;;  %vm512_vm13 = vcmp.eq.s32.totalorder %v3320_v43, %v438_v47 }
  0xd5   : > { %vm3500_vm3 = vmpackc.low %vm513_vm7, %vm512_vm13 }
  0xd6   : > { %v4205_v52 = vsel %vm3500_vm3, 4294967295, %v4204_v52  ;;  %2672 = vmatmul.mubr.msk.bf16.gmra.mxu1 %vm3500_vm3, %v3168_v50 }
  0xd7   : > { %2636 = vmatmul.mubr.msk.bf16.gmra.mxu0 %vm3494_vm14, %v3168_v50  ;;  %v354_v53 = vpop.permute.xlu1 %353  ;;  %v350_v54 = vpop.permute.xlu0 %349  ;;  %2691 = vmatprep.mubr.msk.bf16.mxu1 %vm3167_vm0, %v3166_v1 }
  0xd8   : > { %2639 = vmatprep.mubr.msk.bf16.mxu0 %vm3167_vm0, %v3166_v1  ;;  %vm497_vm13 = vcmp.eq.s32.totalorder %v3320_v43, %v354_v53  ;;  %vm496_vm10 = vcmp.eq.s32.totalorder %v3320_v43, %v350_v54 }
  0xd9   : > { %vm3516_vm11 = vmpackc.low %vm497_vm13, %vm496_vm10  ;;  %vm4212_vm13 = vnez %v4197_v36  ;;  %vm4213_vm10 = vnez %v4201_v42 }
  0xdb   : > { %v255_v55 = vpop.permute.xlu1 %254  ;;  %v251_v56 = vpop.permute.xlu0 %250 }
  0xdc   : > { %vm479_vm7 = vcmp.eq.s32.totalorder %v3320_v43, %v255_v55  ;;  %vm478_vm3 = vcmp.eq.s32.totalorder %v3320_v43, %v251_v56 }
  0xdd   : > { %vm2285_vm12 = vmpackc.low %vm479_vm7, %vm478_vm3  ;;  %vm4211_vm3 = vnez %v4193_v28  ;;  %vm4214_vm7 = vnez %v4205_v52  ;;  %v3101_v52 = vld [vmem:[%s4153_s3 + $0x54] ss:$8 sps:$4 sm:$0xff]  }
  0xde   : > { %2692 = vmatmul.mubr.msk.bf16.vlgmr.msra.gmra.mxu1 %vm2285_vm12, %v3168_v50  ;;  %vm4210_vm12 = vnez %v4189_v19 }
  0xdf   : > { %2640 = vmatmul.mubr.msk.bf16.gmra.mxu0 %vm3516_vm11, %v3168_v50  ;;  %2844 = vmatpush3.bf16.msra.mxu1 %v3077_v58  ;;  %v453_v34 = vpop.permute.xlu1 %452  ;;  %v449_v18 = vpop.permute.xlu0 %448 }
  0xe0   : > { %2695 = vmatprep.mubr.msk.bf16.mxu1 %vm3167_vm0, %v3166_v1  ;;  %2775 = vmatprep.mubr.msk.bf16.mxu0 %vm3167_vm0, %v3166_v1 }
  0xe1   : > { %2845 = vmatprep.subr.bf16.mxu1 %v3166_v1 }
  0xe3   : > { %2846 = vmatpush3.bf16.msra.mxu1 %v3079_v61 }
  0xe4   : > { %2847 = vmatprep.subr.bf16.mxu1 %v3166_v1 }
  0xe6   : > { %2696 = vmatmul.mubr.msk.bf16.gmra.mxu1 %vm3330_vm6, %v3168_v50  ;;  %vm4208_vm6 = vnez %v4181_v59 }
  0xe7   : > { %2776 = vmatmul.mubr.msk.bf16.vlgmr.msra.gmra.mxu0 %vm3348_vm9, %v3168_v50  ;;  %2699 = vmatprep.mubr.msk.bf16.mxu1 %vm3167_vm0, %v3166_v1 }
  0xe8   : > { %2928 = vmatpush3.bf16.msra.mxu0 %v3078_v62  ;;  %2779 = vmatprep.mubr.msk.bf16.mxu0 %vm3167_vm0, %v3166_v1 }
  0xe9   : > { %2929 = vmatprep.subr.bf16.mxu0 %v3166_v1  ;;  %2848 = vmatpush3.bf16.msra.mxu1 %v3081_v63 }
  0xea   : > { %2849 = vmatprep.subr.bf16.mxu1 %v3166_v1 }
  0xec   : > { %2930 = vmatpush3.bf16.msra.mxu0 %v3080_v0 }
  0xed   : > { %2931 = vmatprep.subr.bf16.mxu0 %v3166_v1  ;;  %2850 = vmatpush3.bf16.msra.mxu1 %v3083_v2 }
  0xee   : > { %2700 = vmatmul.mubr.msk.bf16.gmra.mxu1 %vm3348_vm9, %v3168_v50  ;;  %2851 = vmatprep.subr.bf16.mxu1 %v3166_v1  ;;  %vm4209_vm9 = vnez %v4185_v7 }
  0xef   : > { %2780 = vmatmul.mubr.msk.bf16.gmra.mxu0 %vm3374_vm15, %v3168_v50  ;;  %2703 = vmatprep.mubr.msk.bf16.mxu1 %vm3167_vm0, %v3166_v1 }
  0xf0   : > { %2783 = vmatprep.mubr.msk.bf16.mxu0 %vm3167_vm0, %v3166_v1  ;;  %2932 = vmatpush3.bf16.msra.mxu0 %v3082_v49 }
  0xf1   : > { %2933 = vmatprep.subr.bf16.mxu0 %v3166_v1  ;;  %2852 = vmatpush3.bf16.msra.mxu1 %v3085_v3 }
  0xf2   : > { %2853 = vmatprep.subr.bf16.mxu1 %v3166_v1 }
  0xf4   : > { %2934 = vmatpush3.bf16.msra.mxu0 %v3084_v6 }
  0xf5   : > { %2935 = vmatprep.subr.bf16.mxu0 %v3166_v1  ;;  %2854 = vmatpush3.bf16.msra.mxu1 %v3087_v57 }
  0xf6   : > { %2704 = vmatmul.mubr.msk.bf16.gmra.mxu1 %vm3374_vm15, %v3168_v50  ;;  %2855 = vmatprep.subr.bf16.mxu1 %v3166_v1 }
  0xf7   : > { %2784 = vmatmul.mubr.msk.bf16.gmra.mxu0 %vm3400_vm8, %v3168_v50  ;;  %2707 = vmatprep.mubr.msk.bf16.mxu1 %vm3167_vm0, %v3166_v1 }
  0xf8   : > { %2787 = vmatprep.mubr.msk.bf16.mxu0 %vm3167_vm0, %v3166_v1  ;;  %2936 = vmatpush3.bf16.msra.mxu0 %v3086_v9 }
  0xf9   : > { %2937 = vmatprep.subr.bf16.mxu0 %v3166_v1  ;;  %2856 = vmatpush3.bf16.msra.mxu1 %v3089_v10 }
  0xfa   : > { %2857 = vmatprep.subr.bf16.mxu1 %v3166_v1 }
  0xfc   : > { %2938 = vmatpush3.bf16.msra.mxu0 %v3088_v12 }
  0xfd   : > { %2939 = vmatprep.subr.bf16.mxu0 %v3166_v1  ;;  %2858 = vmatpush3.bf16.msra.mxu1 %v3091_v13 }
  0xfe   : > { %2708 = vmatmul.mubr.msk.bf16.gmra.mxu1 %vm3400_vm8, %v3168_v50 }
  0xff   : > { %2788 = vmatmul.mubr.msk.bf16.gmra.mxu0 %vm3426_vm2, %v3168_v50  ;;  %2711 = vmatprep.mubr.msk.bf16.mxu1 %vm3167_vm0, %v3166_v1 }
 0x100   : > { %2791 = vmatprep.mubr.msk.bf16.mxu0 %vm3167_vm0, %v3166_v1  ;;  %2940 = vmatpush3.bf16.msra.mxu0 %v3090_v14 }
 0x101   : > { %2941 = vmatprep.subr.bf16.mxu0 %v3166_v1 }
 0x104   : > { %2942 = vmatpush3.bf16.msra.mxu0 %v3092_v16 }
 0x106   : > { %2712 = vmatmul.mubr.msk.bf16.gmra.mxu1 %vm3426_vm2, %v3168_v50 }
 0x107   : > { %2792 = vmatmul.mubr.msk.bf16.gmra.mxu0 %vm3450_vm1, %v3168_v50  ;;  %2715 = vmatprep.mubr.msk.bf16.mxu1 %vm3167_vm0, %v3166_v1 }
 0x108   : > { %2795 = vmatprep.mubr.msk.bf16.mxu0 %vm3167_vm0, %v3166_v1 }
 0x10e   : > { %2716 = vmatmul.mubr.msk.bf16.gmra.mxu1 %vm3450_vm1, %v3168_v50 }
 0x10f   : > { %2796 = vmatmul.mubr.msk.bf16.gmra.mxu0 %vm3472_vm4, %v3168_v50  ;;  %2719 = vmatprep.mubr.msk.bf16.mxu1 %vm3167_vm0, %v3166_v1 }
 0x110   : > { %2799 = vmatprep.mubr.msk.bf16.mxu0 %vm3167_vm0, %v3166_v1 }
 0x116   : > { %2720 = vmatmul.mubr.msk.bf16.gmra.mxu1 %vm3472_vm4, %v3168_v50 }
 0x117   : > { %2800 = vmatmul.mubr.msk.bf16.gmra.mxu0 %vm3494_vm14, %v3168_v50  ;;  %2723 = vmatprep.mubr.msk.bf16.mxu1 %vm3167_vm0, %v3166_v1 }
 0x118   : > { %2803 = vmatprep.mubr.msk.bf16.mxu0 %vm3167_vm0, %v3166_v1 }
 0x11e   : > { %2724 = vmatmul.mubr.msk.bf16.gmra.mxu1 %vm3494_vm14, %v3168_v50 }
 0x11f   : > { %2804 = vmatmul.mubr.msk.bf16.gmra.mxu0 %vm3516_vm11, %v3168_v50  ;;  %2727 = vmatprep.mubr.msk.bf16.mxu1 %vm3167_vm0, %v3166_v1 }
 0x120   : > { %2807 = vmatprep.mubr.msk.bf16.mxu0 %vm3167_vm0, %v3166_v1 }
 0x126   : > { %2728 = vmatmul.mubr.msk.bf16.gmra.mxu1 %vm3516_vm11, %v3168_v50 }
 0x127   : > { %2808 = vmatmul.mubr.msk.bf16.gmra.mxu0 %vm3326_vm5, %v3168_v50  ;;  %2731 = vmatprep.mubr.msk.bf16.mxu1 %vm3167_vm0, %v3166_v1 }
 0x128   : > { %2811 = vmatprep.mubr.msk.bf16.mxu0 %vm3167_vm0, %v3166_v1 }
 0x12e   : > { %2732 = vmatmul.mubr.msk.bf16.gmra.mxu1 %vm3326_vm5, %v3168_v50 }
 0x12f   : > { %2812 = vmatmul.mubr.msk.bf16.gmra.mxu0 %vm4208_vm6, %v3168_v50  ;;  %2735 = vmatprep.mubr.msk.bf16.mxu1 %vm3167_vm0, %v3166_v1 }
 0x130   : > { %2815 = vmatprep.mubr.msk.bf16.mxu0 %vm3167_vm0, %v3166_v1 }
 0x136   : > { %2736 = vmatmul.mubr.msk.bf16.gmra.mxu1 %vm4208_vm6, %v3168_v50 }
 0x137   : > { %2816 = vmatmul.mubr.msk.bf16.gmra.mxu0 %vm4209_vm9, %v3168_v50  ;;  %2739 = vmatprep.mubr.msk.bf16.mxu1 %vm3167_vm0, %v3166_v1 }
 0x138   : > { %2819 = vmatprep.mubr.msk.bf16.mxu0 %vm3167_vm0, %v3166_v1 }
 0x13e   : > { %2740 = vmatmul.mubr.msk.bf16.gmra.mxu1 %vm4209_vm9, %v3168_v50 }
 0x13f   : > { %2820 = vmatmul.mubr.msk.bf16.gmra.mxu0 %vm4210_vm12, %v3168_v50  ;;  %2743 = vmatprep.mubr.msk.bf16.mxu1 %vm3167_vm0, %v3166_v1 }
 0x140   : > { %2823 = vmatprep.mubr.msk.bf16.mxu0 %vm3167_vm0, %v3166_v1 }
 0x146   : > { %2744 = vmatmul.mubr.msk.bf16.gmra.mxu1 %vm4210_vm12, %v3168_v50 }
 0x147   : > { %2824 = vmatmul.mubr.msk.bf16.gmra.mxu0 %vm4211_vm3, %v3168_v50  ;;  %2747 = vmatprep.mubr.msk.bf16.mxu1 %vm3167_vm0, %v3166_v1 }
 0x148   : > { %2827 = vmatprep.mubr.msk.bf16.mxu0 %vm3167_vm0, %v3166_v1 }
 0x14e   : > { %2748 = vmatmul.mubr.msk.bf16.gmra.mxu1 %vm4211_vm3, %v3168_v50  ;;  %vm514_vm3 = vcmp.eq.s32.totalorder %v3320_v43, %v449_v18 }
 0x14f   : > { %2828 = vmatmul.mubr.msk.bf16.gmra.mxu0 %vm4212_vm13, %v3168_v50  ;;  %2751 = vmatprep.mubr.msk.bf16.mxu1 %vm3167_vm0, %v3166_v1 }
 0x150   : > { %2831 = vmatprep.mubr.msk.bf16.mxu0 %vm3167_vm0, %v3166_v1 }
 0x156   : > { %2752 = vmatmul.mubr.msk.bf16.gmra.mxu1 %vm4212_vm13, %v3168_v50  ;;  %vm515_vm13 = vcmp.eq.s32.totalorder %v3320_v43, %v453_v34 }
 0x157   : > { %2832 = vmatmul.mubr.msk.bf16.gmra.mxu0 %vm4213_vm10, %v3168_v50  ;;  %2755 = vmatprep.mubr.msk.bf16.mxu1 %vm3167_vm0, %v3166_v1 }
 0x158   : > { %2835 = vmatprep.mubr.msk.bf16.mxu0 %vm3167_vm0, %v3166_v1 }
 0x15e   : > { %v3698_v15 = vpop.f32.mrf.mxu1  ;;  %2756 = vmatmul.mubr.msk.bf16.gmra.mxu1 %vm4213_vm10, %v3168_v50  ;;  %vm3718_vm10 = vmpackc.low %vm515_vm13, %vm514_vm3 }
 0x15f   : > { %v3703_v20 = vpop.f32.mrf.mxu0  ;;  %2836 = vmatmul.mubr.msk.bf16.gmra.mxu0 %vm4214_vm7, %v3168_v50  ;;  %2859 = vmatprep.mubr.msk.bf16.mxu1 %vm3167_vm0, %v3166_v1 }
 0x160   : > { %v2645_v21 = vpop.f32.mrf.mxu1  ;;  %2839 = vmatprep.mubr.msk.bf16.mxu0 %vm3167_vm0, %v3166_v1 }
 0x161   : > { %v2609_v22 = vpop.f32.mrf.mxu0 }
 0x162   : > { %v3714_v23 = vpop.f32.mrf.mxu1 }
 0x163   : > { %v3716_v24 = vpop.f32.mrf.mxu0 }
 0x164   : > { %v2646_v26 = vpop.f32.mrf.mxu1 }
 0x165   : > { %v2610_v29 = vpop.f32.mrf.mxu0 }
 0x166   : > { %v3722_v30 = vpop.f32.mrf.mxu1  ;;  %2860 = vmatmul.mubr.msk.bf16.vlgmr.msra.gmra.mxu1 %vm3374_vm15, %v3168_v50  ;;  %vm4218_vm15 = vnez %v4197_v36  ;;  %v3098_v36 = vld [vmem:[%s4153_s3 + $0x64] ss:$8 sps:$4 sm:$0xff]  }
 0x167   : > { %v3727_v31 = vpop.f32.mrf.mxu0  ;;  %2840 = vmatmul.mubr.msk.bf16.gmra.mxu0 %vm3718_vm10, %v3168_v50  ;;  %2863 = vmatprep.mubr.msk.bf16.mxu1 %vm3167_vm0, %v3166_v1 }
 0x168   : > { %v2649_v32 = vpop.f32.mrf.mxu1  ;;  %2943 = vmatprep.mubr.msk.bf16.mxu0 %vm3167_vm0, %v3166_v1 }
 0x169   : > { %v2613_v37 = vpop.f32.mrf.mxu0 }
 0x16a   : > { %v3736_v38 = vpop.f32.mrf.mxu1 }
 0x16b   : > { %v3738_v39 = vpop.f32.mrf.mxu0 }
 0x16c   : > { %v2650_v5 = vpop.f32.mrf.mxu1 }
 0x16d   : > { %v2614_v40 = vpop.f32.mrf.mxu0 }
 0x16e   : > { %v3740_v44 = vpop.f32.mrf.mxu1  ;;  %2864 = vmatmul.mubr.msk.bf16.gmra.mxu1 %vm3400_vm8, %v3168_v50 }
 0x16f   : > { %v3745_v45 = vpop.f32.mrf.mxu0  ;;  %2944 = vmatmul.mubr.msk.bf16.vlgmr.msra.gmra.mxu0 %vm3400_vm8, %v3168_v50  ;;  %2867 = vmatprep.mubr.msk.bf16.mxu1 %vm3167_vm0, %v3166_v1  ;;  %vm4219_vm8 = vnez %v4201_v42 }
 0x170   : > { %v2653_v46 = vpop.f32.mrf.mxu1  ;;  %2947 = vmatprep.mubr.msk.bf16.mxu0 %vm3167_vm0, %v3166_v1 }
 0x171   : > { %v2617_v47 = vpop.f32.mrf.mxu0 }
 0x172   : > { %v3754_v53 = vpop.f32.mrf.mxu1 }
 0x173   : > { %v3756_v54 = vpop.f32.mrf.mxu0 }
 0x174   : > { %v2654_v55 = vpop.f32.mrf.mxu1 }
 0x175   : > { %v2618_v56 = vpop.f32.mrf.mxu0 }
 0x176   : > { %v3758_v58 = vpop.f32.mrf.mxu1  ;;  %2868 = vmatmul.mubr.msk.bf16.gmra.mxu1 %vm3426_vm2, %v3168_v50 }
 0x177   : > { %v3763_v17 = vpop.f32.mrf.mxu0  ;;  %2948 = vmatmul.mubr.msk.bf16.gmra.mxu0 %vm3426_vm2, %v3168_v50  ;;  %2871 = vmatprep.mubr.msk.bf16.mxu1 %vm3167_vm0, %v3166_v1 }
 0x178   : > { %v2657_v61 = vpop.f32.mrf.mxu1  ;;  %2951 = vmatprep.mubr.msk.bf16.mxu0 %vm3167_vm0, %v3166_v1 }
 0x179   : > { %v2621_v62 = vpop.f32.mrf.mxu0 }
 0x17a   : > { %v3772_v63 = vpop.f32.mrf.mxu1 }
 0x17b   : > { %v3774_v0 = vpop.f32.mrf.mxu0 }
 0x17c   : > { %v2658_v2 = vpop.f32.mrf.mxu1 }
 0x17d   : > { %v2622_v49 = vpop.f32.mrf.mxu0 }
 0x17e   : > { %v3776_v3 = vpop.f32.mrf.mxu1  ;;  %2872 = vmatmul.mubr.msk.bf16.gmra.mxu1 %vm3450_vm1, %v3168_v50 }
 0x17f   : > { %v3781_v27 = vpop.f32.mrf.mxu0  ;;  %2952 = vmatmul.mubr.msk.bf16.gmra.mxu0 %vm3450_vm1, %v3168_v50  ;;  %2875 = vmatprep.mubr.msk.bf16.mxu1 %vm3167_vm0, %v3166_v1 }
 0x180   : > { %v2661_v6 = vpop.f32.mrf.mxu1  ;;  %2955 = vmatprep.mubr.msk.bf16.mxu0 %vm3167_vm0, %v3166_v1 }
 0x181   : > { %v2625_v8 = vpop.f32.mrf.mxu0 }
 0x182   : > { %v3790_v57 = vpop.f32.mrf.mxu1 }
 0x183   : > { %v3792_v9 = vpop.f32.mrf.mxu0 }
 0x184   : > { %v2662_v10 = vpop.f32.mrf.mxu1 }
 0x185   : > { %v2626_v12 = vpop.f32.mrf.mxu0 }
 0x186   : > { %v3794_v11 = vpop.f32.mrf.mxu1  ;;  %2876 = vmatmul.mubr.msk.bf16.gmra.mxu1 %vm3472_vm4, %v3168_v50 }
 0x187   : > { %v3799_v35 = vpop.f32.mrf.mxu0  ;;  %2956 = vmatmul.mubr.msk.bf16.gmra.mxu0 %vm3472_vm4, %v3168_v50  ;;  %2879 = vmatprep.mubr.msk.bf16.mxu1 %vm3167_vm0, %v3166_v1 }
 0x188   : > { %v2665_v13 = vpop.f32.mrf.mxu1  ;;  %2959 = vmatprep.mubr.msk.bf16.mxu0 %vm3167_vm0, %v3166_v1 }
 0x189   : > { %v2629_v14 = vpop.f32.mrf.mxu0 }
 0x18a   : > { %v3808_v16 = vpop.f32.mrf.mxu1 }
 0x18b   : > { %v3810_v34 = vpop.f32.mrf.mxu0 }
 0x18c   : > { %v2666_v18 = vpop.f32.mrf.mxu1 }
 0x18d   : > { %v2630_v21 = vpop.f32.mrf.mxu0 }
 0x18e   : > { %v3812_v22 = vpop.f32.mrf.mxu1  ;;  %2880 = vmatmul.mubr.msk.bf16.gmra.mxu1 %vm3494_vm14, %v3168_v50 }
 0x18f   : > { %v3817_v41 = vpop.f32.mrf.mxu0  ;;  %2960 = vmatmul.mubr.msk.bf16.gmra.mxu0 %vm3494_vm14, %v3168_v50  ;;  %2883 = vmatprep.mubr.msk.bf16.mxu1 %vm3167_vm0, %v3166_v1 }
 0x190   : > { %v2669_v26 = vpop.f32.mrf.mxu1  ;;  %2963 = vmatprep.mubr.msk.bf16.mxu0 %vm3167_vm0, %v3166_v1 }
 0x191   : > { %v2633_v29 = vpop.f32.mrf.mxu0 }
 0x192   : > { %v3826_v32 = vpop.f32.mrf.mxu1 }
 0x193   : > { %v3828_v37 = vpop.f32.mrf.mxu0 }
 0x194   : > { %v2670_v5 = vpop.f32.mrf.mxu1 }
 0x195   : > { %v2634_v40 = vpop.f32.mrf.mxu0 }
 0x196   : > { %v3830_v46 = vpop.f32.mrf.mxu1  ;;  %2884 = vmatmul.mubr.msk.bf16.gmra.mxu1 %vm3516_vm11, %v3168_v50 }
 0x197   : > { %v3835_v51 = vpop.f32.mrf.mxu0  ;;  %2964 = vmatmul.mubr.msk.bf16.gmra.mxu0 %vm3516_vm11, %v3168_v50  ;;  %2887 = vmatprep.mubr.msk.bf16.mxu1 %vm3167_vm0, %v3166_v1 }
 0x198   : > { %v2673_v47 = vpop.f32.mrf.mxu1  ;;  %2967 = vmatprep.mubr.msk.bf16.mxu0 %vm3167_vm0, %v3166_v1 }
 0x199   : > { %v2637_v55 = vpop.f32.mrf.mxu0 }
 0x19a   : > { %v3844_v56 = vpop.f32.mrf.mxu1 }
 0x19b   : > { %v3846_v61 = vpop.f32.mrf.mxu0 }
 0x19c   : > { %v2674_v62 = vpop.f32.mrf.mxu1 }
 0x19d   : > { %v2638_v2 = vpop.f32.mrf.mxu0 }
 0x19e   : > { %v957_v49 = vpop.f32.mrf.mxu1  ;;  %2888 = vmatmul.mubr.msk.bf16.gmra.mxu1 %vm3326_vm5, %v3168_v50 }
 0x19f   : > { %v3851_v60 = vpop.f32.mrf.mxu0  ;;  %v958_v6 = vadd.f32 %v957_v49, %v3703_v20  ;;  %2968 = vmatmul.mubr.msk.bf16.gmra.mxu0 %vm3326_vm5, %v3168_v50  ;;  %2891 = vmatprep.mubr.msk.bf16.mxu1 %vm3167_vm0, %v3166_v1  ;;  %vm4217_vm5 = vnez %v4193_v28 }
 0x1a0   : > { %v2693_v8 = vpop.f32.mrf.mxu1  ;;  %2971 = vmatprep.mubr.msk.bf16.mxu0 %vm3167_vm0, %v3166_v1 }
 0x1a1   : > { %v2641_v10 = vpop.f32.mrf.mxu0 }
 0x1a2   : > { %v960_v12 = vpop.f32.mrf.mxu1 }
 0x1a3   : > { %v3861_v13 = vpop.f32.mrf.mxu0  ;;  %v961_v14 = vadd.f32 %v960_v12, %v3716_v24 }
 0x1a4   : > { %v2694_v18 = vpop.f32.mrf.mxu1 }
 0x1a5   : > { %v2642_v21 = vpop.f32.mrf.mxu0 }
 0x1a6   : > { %v965_v20 = vpop.f32.mrf.mxu1  ;;  %2892 = vmatmul.mubr.msk.bf16.gmra.mxu1 %vm4208_vm6, %v3168_v50 }
 0x1a7   : > { %v966_v48 = vadd.f32 %v965_v20, %v3727_v31  ;;  %v1191_v26 = vpop.f32.mrf.mxu0  ;;  %2972 = vmatmul.mubr.msk.bf16.gmra.mxu0 %vm4208_vm6, %v3168_v50  ;;  %2895 = vmatprep.mubr.msk.bf16.mxu1 %vm3167_vm0, %v3166_v1 }
 0x1a8   : > { %v3873_v29 = vadd.f32 %v1191_v26, %v958_v6  ;;  %v2697_v24 = vpop.f32.mrf.mxu1  ;;  %2975 = vmatprep.mubr.msk.bf16.mxu0 %vm3167_vm0, %v3166_v1 }
 0x1a9   : > { %v2777_v5 = vpop.f32.mrf.mxu0 }
 0x1aa   : > { %v968_v40 = vpop.f32.mrf.mxu1  ;;  %v3093_v5 = vld [vmem:[%s4153_s3 + $0x70] ss:$8 sps:$4 sm:$0xff]  }
 0x1ab   : > { %v969_v47 = vadd.f32 %v968_v40, %v3738_v39  ;;  %v1194_v55 = vpop.f32.mrf.mxu0 }
 0x1ac   : > { %v3878_v31 = vadd.f32 %v1194_v55, %v961_v14  ;;  %v2698_v62 = vpop.f32.mrf.mxu1 }
 0x1ad   : > { %v2778_v2 = vpop.f32.mrf.mxu0 }
 0x1ae   : > { %v973_v59 = vpop.f32.mrf.mxu1  ;;  %2896 = vmatmul.mubr.msk.bf16.gmra.mxu1 %vm4209_vm9, %v3168_v50 }
 0x1af   : > { %v974_v49 = vadd.f32 %v973_v59, %v3745_v45  ;;  %v1199_v6 = vpop.f32.mrf.mxu0  ;;  %2976 = vmatmul.mubr.msk.bf16.gmra.mxu0 %vm4209_vm9, %v3168_v50  ;;  %2899 = vmatprep.mubr.msk.bf16.mxu1 %vm3167_vm0, %v3166_v1 }
 0x1b0   : > { %v3889_v39 = vadd.f32 %v1199_v6, %v966_v48  ;;  %v2701_v8 = vpop.f32.mrf.mxu1  ;;  %2979 = vmatprep.mubr.msk.bf16.mxu0 %vm3167_vm0, %v3166_v1 }
 0x1b1   : > { %v2781_v10 = vpop.f32.mrf.mxu0 }
 0x1b2   : > { %v976_v12 = vpop.f32.mrf.mxu1 }
 0x1b3   : > { %v977_v14 = vadd.f32 %v976_v12, %v3756_v54  ;;  %v1202_v18 = vpop.f32.mrf.mxu0 }
 0x1b4   : > { %v3894_v45 = vadd.f32 %v1202_v18, %v969_v47  ;;  %v2702_v21 = vpop.f32.mrf.mxu1 }
 0x1b5   : > { %v2782_v20 = vpop.f32.mrf.mxu0 }
 0x1b6   : > { %v981_v7 = vpop.f32.mrf.mxu1  ;;  %2900 = vmatmul.mubr.msk.bf16.gmra.mxu1 %vm4210_vm12, %v3168_v50 }
 0x1b7   : > { %v982_v48 = vadd.f32 %v981_v7, %v3763_v17  ;;  %v1207_v26 = vpop.f32.mrf.mxu0  ;;  %2980 = vmatmul.mubr.msk.bf16.gmra.mxu0 %vm4210_vm12, %v3168_v50  ;;  %2903 = vmatprep.mubr.msk.bf16.mxu1 %vm3167_vm0, %v3166_v1  ;;  %v3095_v17 = vld [vmem:[%s4153_s3 + $0x74] ss:$8 sps:$4 sm:$0xff]  }
 0x1b8   : > { %v3905_v54 = vadd.f32 %v1207_v26, %v974_v49  ;;  %v2705_v24 = vpop.f32.mrf.mxu1  ;;  %2983 = vmatprep.mubr.msk.bf16.mxu0 %vm3167_vm0, %v3166_v1  ;;  %2048 = vmatprep.subr.bf16.mxu1 %v3095_v17 }
 0x1b9   : > { %v2785_v40 = vpop.f32.mrf.mxu0  ;;  %2049 = vmatpush1.bf16.msra.mxu1 %v3093_v5 }
 0x1ba   : > { %v984_v19 = vpop.f32.mrf.mxu1  ;;  %2050 = vmatprep.subr.bf16.mxu1 %v3098_v36 }
 0x1bb   : > { %v985_v47 = vadd.f32 %v984_v19, %v3774_v0  ;;  %v1210_v55 = vpop.f32.mrf.mxu0 }
 0x1bc   : > { %v3916_v62 = vadd.f32 %v1210_v55, %v977_v14  ;;  %v2706_v2 = vpop.f32.mrf.mxu1 }
 0x1bd   : > { %v2786_v59 = vpop.f32.mrf.mxu0 }
 0x1be   : > { %v989_v49 = vpop.f32.mrf.mxu1  ;;  %2904 = vmatmul.mubr.msk.bf16.gmra.mxu1 %vm4217_vm5, %v3168_v50 }
 0x1bf   : > { %v990_v6 = vadd.f32 %v989_v49, %v3781_v27  ;;  %v1215_v8 = vpop.f32.mrf.mxu0  ;;  %2984 = vmatmul.mubr.msk.bf16.gmra.mxu0 %vm4217_vm5, %v3168_v50  ;;  %2907 = vmatprep.mubr.msk.bf16.mxu1 %vm3167_vm0, %v3166_v1 }
 0x1c0   : > { %v3927_v0 = vadd.f32 %v1215_v8, %v982_v48  ;;  %v2709_v10 = vpop.f32.mrf.mxu1  ;;  %2987 = vmatprep.mubr.msk.bf16.mxu0 %vm3167_vm0, %v3166_v1 }
 0x1c1   : > { %v2789_v12 = vpop.f32.mrf.mxu0 }
 0x1c2   : > { %v992_v14 = vpop.f32.mrf.mxu1 }
 0x1c3   : > { %v993_v18 = vadd.f32 %v992_v14, %v3792_v9  ;;  %v1218_v21 = vpop.f32.mrf.mxu0 }
 0x1c4   : > { %v3932_v27 = vadd.f32 %v1218_v21, %v985_v47  ;;  %v2710_v20 = vpop.f32.mrf.mxu1 }
 0x1c5   : > { %v2790_v7 = vpop.f32.mrf.mxu0 }
 0x1c6   : > { %v997_v28 = vpop.f32.mrf.mxu1  ;;  %2908 = vmatmul.mubr.msk.bf16.gmra.mxu1 %vm4218_vm15, %v3168_v50 }
 0x1c7   : > { %v998_v48 = vadd.f32 %v997_v28, %v3799_v35  ;;  %v1223_v26 = vpop.f32.mrf.mxu0  ;;  %2988 = vmatmul.mubr.msk.bf16.gmra.mxu0 %vm4218_vm15, %v3168_v50  ;;  %2911 = vmatprep.mubr.msk.bf16.mxu1 %vm3167_vm0, %v3166_v1  ;;  %v3096_v35 = vld [vmem:[%s4153_s3 + $0x60] ss:$8 sps:$4 sm:$0xff]  }
 0x1c8   : > { %v3943_v9 = vadd.f32 %v1223_v26, %v990_v6  ;;  %v2713_v24 = vpop.f32.mrf.mxu1  ;;  %2991 = vmatprep.mubr.msk.bf16.mxu0 %vm3167_vm0, %v3166_v1  ;;  %2051 = vmatpush1.bf16.msra.mxu1 %v3096_v35 }
 0x1c9   : > { %v2793_v5 = vpop.f32.mrf.mxu0  ;;  %2052 = vmatprep.subr.bf16.mxu1 %v3101_v52 }
 0x1ca   : > { %v1000_v17 = vpop.f32.mrf.mxu1 }
 0x1cb   : > { %v1001_v40 = vadd.f32 %v1000_v17, %v3810_v34  ;;  %v1226_v19 = vpop.f32.mrf.mxu0 }
 0x1cc   : > { %v3954_v47 = vadd.f32 %v1226_v19, %v993_v18  ;;  %v2714_v55 = vpop.f32.mrf.mxu1 }
 0x1cd   : > { %v2794_v2 = vpop.f32.mrf.mxu0  ;;  %v460_v55 = vpop.permute.xlu0 %459 }
 0x1ce   : > { %v1005_v59 = vpop.f32.mrf.mxu1  ;;  %2912 = vmatmul.mubr.msk.bf16.gmra.mxu1 %vm4219_vm8, %v3168_v50  ;;  %vm516_vm1 = vcmp.eq.s32.totalorder %v3320_v43, %v460_v55 }
 0x1cf   : > { %v1006_v49 = vadd.f32 %v1005_v59, %v3817_v41  ;;  %v1231_v6 = vpop.f32.mrf.mxu0  ;;  %2992 = vmatmul.mubr.msk.bf16.gmra.mxu0 %vm4219_vm8, %v3168_v50  ;;  %2915 = vmatprep.mubr.msk.bf16.mxu1 %vm3167_vm0, %v3166_v1 }
 0x1d0   : > { %v3965_v34 = vadd.f32 %v1231_v6, %v998_v48  ;;  %v2717_v8 = vpop.f32.mrf.mxu1  ;;  %2995 = vmatprep.mubr.msk.bf16.mxu0 %vm3167_vm0, %v3166_v1 }
 0x1d1   : > { %v2797_v10 = vpop.f32.mrf.mxu0 }
 0x1d2   : > { %v1008_v12 = vpop.f32.mrf.mxu1 }
 0x1d3   : > { %v1009_v14 = vadd.f32 %v1008_v12, %v3828_v37  ;;  %v1234_v18 = vpop.f32.mrf.mxu0 }
 0x1d4   : > { %v3970_v41 = vadd.f32 %v1234_v18, %v1001_v40  ;;  %v2718_v21 = vpop.f32.mrf.mxu1  ;;  %v464_v40 = vpop.permute.xlu1 %463 }
 0x1d5   : > { %v2798_v20 = vpop.f32.mrf.mxu0  ;;  %vm517_vm2 = vcmp.eq.s32.totalorder %v3320_v43, %v464_v40 }
 0x1d6   : > { %v1013_v42 = vpop.f32.mrf.mxu1  ;;  %2916 = vmatmul.mubr.msk.bf16.gmra.mxu1 %vm4214_vm7, %v3168_v50  ;;  %vm2401_vm4 = vmpackc.low %vm517_vm2, %vm516_vm1 }
 0x1d7   : > { %v1014_v7 = vadd.f32 %v1013_v42, %v3835_v51  ;;  %v1239_v28 = vpop.f32.mrf.mxu0  ;;  %2996 = vmatmul.mubr.msk.bf16.gmra.mxu0 %vm4214_vm7, %v3168_v50  ;;  %2919 = vmatprep.mubr.msk.bf16.mxu1 %vm3167_vm0, %v3166_v1  ;;  %v3099_v51 = vld [vmem:[%s4153_s3 + $0x50] ss:$8 sps:$4 sm:$0xff]   ;;  %v471_v42 = vpop.permute.xlu0 %470 }
 0x1d8   : > { %v3981_v37 = vadd.f32 %v1239_v28, %v1006_v49  ;;  %v2721_v48 = vpop.f32.mrf.mxu1  ;;  %2999 = vmatprep.mubr.msk.bf16.mxu0 %vm3167_vm0, %v3166_v1  ;;  %2053 = vmatpush1.bf16.msra.mxu1 %v3099_v51  ;;  %v475_v21 = vpop.permute.xlu1 %474  ;;  %vm518_vm11 = vcmp.eq.s32.totalorder %v3320_v43, %v471_v42  ;;  %v3104_v51 = vld [vmem:[%s4153_s3 + $0x44] ss:$8 sps:$4 sm:$0xff]  }
 0x1d9   : > { %v2801_v26 = vpop.f32.mrf.mxu0  ;;  %vm519_vm14 = vcmp.eq.s32.totalorder %v3320_v43, %v475_v21  ;;  %2054 = vmatprep.subr.bf16.mxu1 %v3104_v51  ;;  %v3107_v51 = vld [vmem:[%s4153_s3 + $0x34] ss:$8 sps:$4 sm:$0xff]  }
 0x1da   : > { %v1016_v24 = vpop.f32.mrf.mxu1  ;;  %vm2443_vm6 = vmpackc.low %vm519_vm14, %vm518_vm11 }
 0x1db   : > { %v1017_v5 = vadd.f32 %v1016_v24, %v3846_v61  ;;  %v1242_v17 = vpop.f32.mrf.mxu0  ;;  %v3102_v24 = vld [vmem:[%s4153_s3 + $0x40] ss:$8 sps:$4 sm:$0xff]  }
 0x1dc   : > { %v3992_v35 = vadd.f32 %v1242_v17, %v1009_v14  ;;  %v2722_v36 = vpop.f32.mrf.mxu1  ;;  %2055 = vmatpush1.bf16.msra.mxu1 %v3102_v24 }
 0x1dd   : > { %v2802_v19 = vpop.f32.mrf.mxu0  ;;  %2056 = vmatprep.subr.bf16.mxu1 %v3107_v51 }
 0x1de   : > { %v1021_v2 = vpop.f32.mrf.mxu1  ;;  %2920 = vmatmul.mubr.msk.bf16.gmra.mxu1 %vm3718_vm10, %v3168_v50 }
 0x1df   : > { %v1022_v59 = vadd.f32 %v1021_v2, %v3851_v60  ;;  %v1247_v49 = vpop.f32.mrf.mxu0  ;;  %3000 = vmatmul.mubr.msk.bf16.gmra.mxu0 %vm3718_vm10, %v3168_v50  ;;  %2923 = vmatprep.mubr.msk.bf16.mxu1 %vm3167_vm0, %v3166_v1 }
 0x1e0   : > { %v4003_v61 = vadd.f32 %v1247_v49, %v1014_v7  ;;  %v2725_v6 = vpop.f32.mrf.mxu1  ;;  %3003 = vmatprep.mubr.msk.bf16.mxu0 %vm3167_vm0, %v3166_v1 }
 0x1e1   : > { %v2805_v8 = vpop.f32.mrf.mxu0 }
 0x1e2   : > { %v1024_v60 = vpop.f32.mrf.mxu1 }
 0x1e3   : > { %v1025_v10 = vadd.f32 %v1024_v60, %v3861_v13  ;;  %v1250_v12 = vpop.f32.mrf.mxu0 }
 0x1e4   : > { %v4010_v25 = vadd.f32 %v1250_v12, %v1017_v5  ;;  %v2726_v14 = vpop.f32.mrf.mxu1 }
 0x1e5   : > { %v2806_v18 = vpop.f32.mrf.mxu0 }
 0x1e6   : > { %v1029_v20 = vpop.f32.mrf.mxu1  ;;  %2924 = vmatmul.mubr.msk.bf16.gmra.mxu1 %vm2401_vm4, %v3168_v50 }
 0x1e7   : > { %v1255_v7 = vpop.f32.mrf.mxu0  ;;  %3004 = vmatmul.mubr.msk.bf16.gmra.mxu0 %vm2401_vm4, %v3168_v50  ;;  %v1030_v36 = vadd.f32 %v1029_v20, %v3698_v15 }
 0x1e8   : > { %v4014_v28 = vadd.f32 %v1255_v7, %v1022_v59  ;;  %v2729_v48 = vpop.f32.mrf.mxu1  ;;  %3007 = vmatprep.mubr.msk.bf16.mxu0 %vm3167_vm0, %v3166_v1 }
 0x1e9   : > { %v2809_v13 = vpop.f32.mrf.mxu0 }
 0x1ea   : > { %v1032_v26 = vpop.f32.mrf.mxu1 }
 0x1eb   : > { %v1258_v52 = vpop.f32.mrf.mxu0  ;;  %v1033_v59 = vadd.f32 %v1032_v26, %v3714_v23 }
 0x1ec   : > { %v4026_v5 = vadd.f32 %v1258_v52, %v1025_v10  ;;  %v2730_v17 = vpop.f32.mrf.mxu1 }
 0x1ed   : > { %v2810_v1 = vpop.f32.mrf.mxu0 }
 0x1ee   : > { %v1037_v43 = vpop.f32.mrf.mxu1 }
 0x1ef   : > { %v1263_v40 = vpop.f32.mrf.mxu0  ;;  %3008 = vmatmul.mubr.msk.bf16.gmra.mxu0 %vm2443_vm6, %v3168_v50  ;;  %v1038_v12 = vadd.f32 %v1037_v43, %v3722_v30  ;;  %v3105_v30 = vld [vmem:[%s4153_s3 + $0x30] ss:$8 sps:$4 sm:$0xff]  }
 0x1f0   : > { %v4030_v19 = vadd.f32 %v1263_v40, %v1030_v36  ;;  %v2733_v55 = vpop.f32.mrf.mxu1  ;;  %2057 = vmatpush1.bf16.msra.mxu1 %v3105_v30 }
 0x1f1   : > { %v2813_v2 = vpop.f32.mrf.mxu0 }
 0x1f2   : > { %v1040_v49 = vpop.f32.mrf.mxu1 }
 0x1f3   : > { %v1266_v6 = vpop.f32.mrf.mxu0  ;;  %v1041_v20 = vadd.f32 %v1040_v49, %v3736_v38 }
 0x1f4   : > { %v4033_v8 = vadd.f32 %v1266_v6, %v1033_v59  ;;  %v2734_v60 = vpop.f32.mrf.mxu1 }
 0x1f5   : > { %v2814_v10 = vpop.f32.mrf.mxu0 }
 0x1f6   : > { %v1045_v14 = vpop.f32.mrf.mxu1 }
 0x1f7   : > { %v1271_v15 = vpop.f32.mrf.mxu0  ;;  %v1046_v26 = vadd.f32 %v1045_v14, %v3740_v44 }
 0x1f8   : > { %v4036_v18 = vadd.f32 %v1271_v15, %v1038_v12  ;;  %v2737_v21 = vpop.f32.mrf.mxu1 }
 0x1f9   : > { %v2817_v50 = vpop.f32.mrf.mxu0 }
 0x1fa   : > { %v1048_v42 = vpop.f32.mrf.mxu1 }
 0x1fb   : > { %v1274_v7 = vpop.f32.mrf.mxu0  ;;  %v1049_v36 = vadd.f32 %v1048_v42, %v3754_v53 }
 0x1fc   : > { %v4039_v48 = vadd.f32 %v1274_v7, %v1041_v20  ;;  %v2738_v23 = vpop.f32.mrf.mxu1 }
 0x1fd   : > { %v2818_v13 = vpop.f32.mrf.mxu0  ;;  %v3110_v23 = vld [vmem:[%s4153_s3 + $0x24] ss:$8 sps:$4 sm:$0xff]  }
 0x1fe   : > { %v1053_v24 = vpop.f32.mrf.mxu1  ;;  %2058 = vmatprep.subr.bf16.mxu1 %v3110_v23 }
 0x1ff   : > { %v1279_v52 = vpop.f32.mrf.mxu0  ;;  %v1054_v59 = vadd.f32 %v1053_v24, %v3758_v58  ;;  %v3108_v58 = vld [vmem:[%s4153_s3 + $0x20] ss:$8 sps:$4 sm:$0xff]  }
 0x200   : > { %v4048_v17 = vadd.f32 %v1279_v52, %v1046_v26  ;;  %v2741_v38 = vpop.f32.mrf.mxu1  ;;  %2059 = vmatpush1.bf16.msra.mxu1 %v3108_v58 }
 0x201   : > { %v2821_v1 = vpop.f32.mrf.mxu0 }
 0x202   : > { %v1056_v43 = vpop.f32.mrf.mxu1 }
 0x203   : > { %v1282_v44 = vpop.f32.mrf.mxu0  ;;  %v1057_v14 = vadd.f32 %v1056_v43, %v3772_v63 }
 0x204   : > { %v4051_v40 = vadd.f32 %v1282_v44, %v1049_v36  ;;  %v2742_v55 = vpop.f32.mrf.mxu1 }
 0x205   : > { %v2822_v2 = vpop.f32.mrf.mxu0 }
 0x206   : > { %v1061_v49 = vpop.f32.mrf.mxu1 }
 0x207   : > { %v1287_v6 = vpop.f32.mrf.mxu0  ;;  %v1062_v42 = vadd.f32 %v1061_v49, %v3776_v3 }
 0x208   : > { %v4054_v60 = vadd.f32 %v1287_v6, %v1054_v59  ;;  %v2745_v10 = vpop.f32.mrf.mxu1 }
 0x209   : > { %v2825_v12 = vpop.f32.mrf.mxu0 }
 0x20a   : > { %v1064_v15 = vpop.f32.mrf.mxu1 }
 0x20b   : > { %v1290_v21 = vpop.f32.mrf.mxu0  ;;  %v1065_v30 = vadd.f32 %v1064_v15, %v3790_v57 }
 0x20c   : > { %v4057_v50 = vadd.f32 %v1290_v21, %v1057_v14  ;;  %v2746_v53 = vpop.f32.mrf.mxu1 }
 0x20d   : > { %v2826_v20 = vpop.f32.mrf.mxu0  ;;  %v3113_v53 = vld [vmem:[%s4153_s3 + $0x14] ss:$8 sps:$4 sm:$0xff]  }
 0x20e   : > { %v1069_v7 = vpop.f32.mrf.mxu1  ;;  %2060 = vmatprep.subr.bf16.mxu1 %v3113_v53 }
 0x20f   : > { %v1295_v13 = vpop.f32.mrf.mxu0  ;;  %v1070_v36 = vadd.f32 %v1069_v7, %v3794_v11  ;;  %v3111_v11 = vld [vmem:[%s4153_s3 + $0x10] ss:$8 sps:$4 sm:$0xff]  }
 0x210   : > { %v4066_v26 = vadd.f32 %v1295_v13, %v1062_v42  ;;  %v2749_v63 = vpop.f32.mrf.mxu1  ;;  %2061 = vmatpush1.bf16.msra.mxu1 %v3111_v11 }
 0x211   : > { %v2829_v24 = vpop.f32.mrf.mxu0 }
 0x212   : > { %v1072_v51 = vpop.f32.mrf.mxu1 }
 0x213   : > { %v1298_v3 = vpop.f32.mrf.mxu0  ;;  %v1073_v49 = vadd.f32 %v1072_v51, %v3808_v16 }
 0x214   : > { %v4069_v52 = vadd.f32 %v1298_v3, %v1065_v30  ;;  %v2750_v38 = vpop.f32.mrf.mxu1 }
 0x215   : > { %v2830_v1 = vpop.f32.mrf.mxu0 }
 0x216   : > { %v1077_v43 = vpop.f32.mrf.mxu1 }
 0x217   : > { %v1303_v44 = vpop.f32.mrf.mxu0  ;;  %v1078_v15 = vadd.f32 %v1077_v43, %v3812_v22 }
 0x218   : > { %v4072_v55 = vadd.f32 %v1303_v44, %v1070_v36  ;;  %v2753_v2 = vpop.f32.mrf.mxu1 }
 0x219   : > { %v2833_v59 = vpop.f32.mrf.mxu0 }
 0x21a   : > { %v1080_v6 = vpop.f32.mrf.mxu1 }
 0x21b   : > { %v1306_v10 = vpop.f32.mrf.mxu0  ;;  %v1081_v58 = vadd.f32 %v1080_v6, %v3826_v32 }
 0x21c   : > { %v4075_v12 = vadd.f32 %v1306_v10, %v1073_v49  ;;  %v2754_v57 = vpop.f32.mrf.mxu1 }
 0x21d   : > { %v2834_v14 = vpop.f32.mrf.mxu0 }
 0x21e   : > { %v1085_v21 = vpop.f32.mrf.mxu1 }
 0x21f   : > { %v1311_v20 = vpop.f32.mrf.mxu0  ;;  %v1086_v30 = vadd.f32 %v1085_v21, %v3830_v46  ;;  %v3114_v46 = vld [vmem:[%s4153_s3] ss:$8 sps:$4 sm:$0xff]  }
 0x220   : > { %v4084_v42 = vadd.f32 %v1311_v20, %v1078_v15  ;;  %v2757_v16 = vpop.f32.mrf.mxu1 }
 0x221   : > { %v2837_v7 = vpop.f32.mrf.mxu0 }
 0x222   : > { %v1088_v23 = vpop.f32.mrf.mxu1 }
 0x223   : > { %v1314_v22 = vpop.f32.mrf.mxu0  ;;  %v1089_v44 = vadd.f32 %v1088_v23, %v3844_v56 }
 0x224   : > { %v4087_v13 = vadd.f32 %v1314_v22, %v1081_v58  ;;  %v2758_v63 = vpop.f32.mrf.mxu1 }
 0x225   : > { %v2838_v24 = vpop.f32.mrf.mxu0 }
 0x226   : > { %v1459_v51 = vpop.f32.mrf.mxu1 }
 0x227   : > { %v1319_v3 = vpop.f32.mrf.mxu0  ;;  %v1594_v38 = vadd.f32 %v1459_v51, %v3873_v29  ;;  %v3116_v29 = vld [vmem:[%s4153_s3 + $0x4] ss:$8 sps:$4 sm:$0xff]  }
 0x228   : > { %v4091_v1 = vadd.f32 %v1319_v3, %v1086_v30  ;;  %v2861_v36 = vpop.f32.mrf.mxu1  ;;  %2062 = vmatprep.subr.bf16.mxu1 %v3116_v29 }
 0x229   : > { %v2841_v43 = vpop.f32.mrf.mxu0  ;;  %2063 = vmatpush1.bf16.msra.mxu1 %v3114_v46 }
 0x22a   : > { %v1462_v2 = vpop.f32.mrf.mxu1 }
 0x22b   : > { %v1322_v32 = vpop.f32.mrf.mxu0  ;;  %v1595_v59 = vadd.f32 %v1462_v2, %v3878_v31 }
 0x22c   : > { %v4095_v49 = vadd.f32 %v1322_v32, %v1089_v44  ;;  %v2862_v6 = vpop.f32.mrf.mxu1 }
 0x22d   : > { %v2842_v10 = vpop.f32.mrf.mxu0 }
 0x22e   : > { %v1467_v57 = vpop.f32.mrf.mxu1 }
 0x22f   : > { %v1596_v14 = vadd.f32 %v1467_v57, %v3889_v39  ;;  %v1727_v56 = vpop.f32.mrf.mxu0 }
 0x230   : > { %v1862_v15 = vadd.f32 %v1727_v56, %v1594_v38  ;;  %v2865_v21 = vpop.f32.mrf.mxu1 }
 0x231   : > { %v2945_v31 = vpop.f32.mrf.mxu0 }
 0x232   : > { %v1470_v11 = vpop.f32.mrf.mxu1 }
 0x233   : > { %v1597_v53 = vadd.f32 %v1470_v11, %v3894_v45  ;;  %v1730_v20 = vpop.f32.mrf.mxu0 }
 0x234   : > { %v1863_v16 = vadd.f32 %v1730_v20, %v1595_v59  ;;  %v2866_v7 = vpop.f32.mrf.mxu1  ;;  %v3169_v59 = vmov 0  }
 0x235   : > { %v2946_v58 = vpop.f32.mrf.mxu0  ;;  %2080 = vmatprep.mubr.bf16.mxu1 %v3169_v59 }
 0x236   : > { %v1475_v23 = vpop.f32.mrf.mxu1 }
 0x237   : > { %v1598_v22 = vadd.f32 %v1475_v23, %v3905_v54  ;;  %v1735_v63 = vpop.f32.mrf.mxu0 }
 0x238   : > { %v1864_v24 = vadd.f32 %v1735_v63, %v1596_v14  ;;  %v2869_v30 = vpop.f32.mrf.mxu1 }
 0x239   : > { %v2949_v39 = vpop.f32.mrf.mxu0 }
 0x23a   : > { %v1478_v51 = vpop.f32.mrf.mxu1 }
 0x23b   : > { %v1599_v3 = vadd.f32 %v1478_v51, %v3916_v62  ;;  %v1738_v38 = vpop.f32.mrf.mxu0 }
 0x23c   : > { %v1865_v36 = vadd.f32 %v1738_v38, %v1597_v53  ;;  %v2870_v43 = vpop.f32.mrf.mxu1 }
 0x23d   : > { %v2950_v44 = vpop.f32.mrf.mxu0 }
 0x23e   : > { %v1483_v2 = vpop.f32.mrf.mxu1 }
 0x23f   : > { %v1600_v45 = vadd.f32 %v1483_v2, %v3927_v0  ;;  %v1743_v32 = vpop.f32.mrf.mxu0 }
 0x240   : > { %v1866_v6 = vadd.f32 %v1743_v32, %v1598_v22  ;;  %v2873_v10 = vpop.f32.mrf.mxu1 }
 0x241   : > { %v2953_v54 = vpop.f32.mrf.mxu0 }
 0x242   : > { %v1896_v57 = vmax.f32 %v1862_v15, %v1866_v6  ;;  %v1486_v46 = vpop.f32.mrf.mxu1 }
 0x243   : > { %v1601_v29 = vadd.f32 %v1486_v46, %v3932_v27  ;;  %v1746_v14 = vpop.f32.mrf.mxu0 }
 0x244   : > { %v1867_v56 = vadd.f32 %v1746_v14, %v1599_v3  ;;  %v2874_v62 = vpop.f32.mrf.mxu1 }
 0x245   : > { %v2954_v21 = vpop.f32.mrf.mxu0 }
 0x246   : > { %v1912_v31 = vmax.f32 %v1863_v16, %v1867_v56  ;;  %v1491_v11 = vpop.f32.mrf.mxu1 }
 0x247   : > { %v1602_v53 = vadd.f32 %v1491_v11, %v3943_v9  ;;  %v1751_v20 = vpop.f32.mrf.mxu0 }
 0x248   : > { %v1868_v0 = vadd.f32 %v1751_v20, %v1600_v45  ;;  %v2877_v7 = vpop.f32.mrf.mxu1 }
 0x249   : > { %v2957_v58 = vpop.f32.mrf.mxu0 }
 0x24a   : > { %v1897_v23 = vmax.f32 %v1864_v24, %v1868_v0  ;;  %v1494_v22 = vpop.f32.mrf.mxu1 }
 0x24b   : > { %v1603_v63 = vadd.f32 %v1494_v22, %v3954_v47  ;;  %v1754_v15 = vpop.f32.mrf.mxu0 }
 0x24c   : > { %v1869_v30 = vadd.f32 %v1754_v15, %v1601_v29  ;;  %v2878_v39 = vpop.f32.mrf.mxu1 }
 0x24d   : > { %v2958_v27 = vpop.f32.mrf.mxu0 }
 0x24e   : > { %v1913_v51 = vmax.f32 %v1865_v36, %v1869_v30  ;;  %v1499_v3 = vpop.f32.mrf.mxu1 }
 0x24f   : > { %v1604_v38 = vadd.f32 %v1499_v3, %v3965_v34  ;;  %v1759_v16 = vpop.f32.mrf.mxu0 }
 0x250   : > { %v1870_v43 = vadd.f32 %v1759_v16, %v1602_v53  ;;  %v2881_v44 = vpop.f32.mrf.mxu1 }
 0x251   : > { %v2961_v9 = vpop.f32.mrf.mxu0 }
 0x252   : > { %v1898_v2 = vmax.f32 %v1896_v57, %v1870_v43  ;;  %v1502_v45 = vpop.f32.mrf.mxu1 }
 0x253   : > { %v1605_v32 = vadd.f32 %v1502_v45, %v3970_v41  ;;  %v1762_v24 = vpop.f32.mrf.mxu0 }
 0x254   : > { %v1871_v59 = vadd.f32 %v1762_v24, %v1603_v63  ;;  %v2882_v6 = vpop.f32.mrf.mxu1 }
 0x255   : > { %v2962_v47 = vpop.f32.mrf.mxu0 }
 0x256   : > { %v1914_v10 = vmax.f32 %v1912_v31, %v1871_v59  ;;  %v1507_v54 = vpop.f32.mrf.mxu1 }
 0x257   : > { %v1606_v46 = vadd.f32 %v1507_v54, %v3981_v37  ;;  %v1767_v36 = vpop.f32.mrf.mxu0 }
 0x258   : > { %v1872_v29 = vadd.f32 %v1767_v36, %v1604_v38  ;;  %v2885_v14 = vpop.f32.mrf.mxu1 }
 0x259   : > { %v2965_v34 = vpop.f32.mrf.mxu0 }
 0x25a   : > { %v1899_v56 = vmax.f32 %v1897_v23, %v1872_v29  ;;  %v1510_v62 = vpop.f32.mrf.mxu1 }
 0x25b   : > { %v1607_v21 = vadd.f32 %v1510_v62, %v3992_v35  ;;  %v1770_v57 = vpop.f32.mrf.mxu0 }
 0x25c   : > { %v1873_v11 = vadd.f32 %v1770_v57, %v1605_v32  ;;  %v2886_v53 = vpop.f32.mrf.mxu1 }
 0x25d   : > { %v2966_v41 = vpop.f32.mrf.mxu0 }
 0x25e   : > { %v1915_v20 = vmax.f32 %v1913_v51, %v1873_v11  ;;  %v1515_v0 = vpop.f32.mrf.mxu1 }
 0x25f   : > { %v1608_v7 = vadd.f32 %v1515_v0, %v4003_v61  ;;  %v1775_v31 = vpop.f32.mrf.mxu0 }
 0x260   : > { %v1874_v58 = vadd.f32 %v1775_v31, %v1606_v46  ;;  %v2889_v22 = vpop.f32.mrf.mxu1 }
 0x261   : > { %v2969_v37 = vpop.f32.mrf.mxu0 }
 0x262   : > { %v1900_v63 = vmax.f32 %v1898_v2, %v1874_v58  ;;  %v1518_v15 = vpop.f32.mrf.mxu1 }
 0x263   : > { %v1609_v30 = vadd.f32 %v1518_v15, %v4010_v25  ;;  %v1778_v23 = vpop.f32.mrf.mxu0 }
 0x264   : > { %v1875_v39 = vadd.f32 %v1778_v23, %v1607_v21  ;;  %v2890_v27 = vpop.f32.mrf.mxu1 }
 0x265   : > { %v2970_v35 = vpop.f32.mrf.mxu0 }
 0x266   : > { %v1916_v3 = vmax.f32 %v1914_v10, %v1875_v39  ;;  %v1523_v38 = vpop.f32.mrf.mxu1 }
 0x267   : > { %v1610_v16 = vadd.f32 %v1523_v38, %v4014_v28  ;;  %v1783_v51 = vpop.f32.mrf.mxu0 }
 0x268   : > { %v1876_v43 = vadd.f32 %v1783_v51, %v1608_v7  ;;  %v2893_v44 = vpop.f32.mrf.mxu1 }
 0x269   : > { %v2973_v61 = vpop.f32.mrf.mxu0 }
 0x26a   : > { %v1901_v9 = vmax.f32 %v1899_v56, %v1876_v43  ;;  %v1526_v45 = vpop.f32.mrf.mxu1 }
 0x26b   : > { %v1786_v32 = vpop.f32.mrf.mxu0  ;;  %v1611_v10 = vadd.f32 %v1526_v45, %v4026_v5 }
 0x26c   : > { %v1877_v24 = vadd.f32 %v1786_v32, %v1609_v30  ;;  %v2894_v2 = vpop.f32.mrf.mxu1 }
 0x26d   : > { %v2974_v59 = vpop.f32.mrf.mxu0 }
 0x26e   : > { %v1917_v6 = vmax.f32 %v1915_v20, %v1877_v24  ;;  %v1531_v25 = vpop.f32.mrf.mxu1 }
 0x26f   : > { %v1791_v47 = vpop.f32.mrf.mxu0  ;;  %v1612_v56 = vadd.f32 %v1531_v25, %v4030_v19 }
 0x270   : > { %v1878_v54 = vadd.f32 %v1791_v47, %v1610_v16  ;;  %v2897_v46 = vpop.f32.mrf.mxu1 }
 0x271   : > { %v2977_v36 = vpop.f32.mrf.mxu0 }
 0x272   : > { %v1902_v29 = vmax.f32 %v1900_v63, %v1878_v54  ;;  %v1534_v28 = vpop.f32.mrf.mxu1 }
 0x273   : > { %v1794_v14 = vpop.f32.mrf.mxu0  ;;  %v1613_v7 = vadd.f32 %v1534_v28, %v4033_v8 }
 0x274   : > { %v1879_v34 = vadd.f32 %v1794_v14, %v1611_v10  ;;  %v2898_v62 = vpop.f32.mrf.mxu1 }
 0x275   : > { %v2978_v21 = vpop.f32.mrf.mxu0 }
 0x276   : > { %v1918_v57 = vmax.f32 %v1916_v3, %v1879_v34  ;;  %v1539_v11 = vpop.f32.mrf.mxu1 }
 0x277   : > { %v1799_v53 = vpop.f32.mrf.mxu0  ;;  %v1614_v15 = vadd.f32 %v1539_v11, %v4036_v18 }
 0x278   : > { %v1880_v41 = vadd.f32 %v1799_v53, %v1612_v56  ;;  %v2901_v20 = vpop.f32.mrf.mxu1 }
 0x279   : > { %v2981_v0 = vpop.f32.mrf.mxu0 }
 0x27a   : > { %v1903_v31 = vmax.f32 %v1901_v9, %v1880_v41  ;;  %v1542_v58 = vpop.f32.mrf.mxu1 }
 0x27b   : > { %v1802_v22 = vpop.f32.mrf.mxu0  ;;  %v1615_v3 = vadd.f32 %v1542_v58, %v4039_v48 }
 0x27c   : > { %v1881_v5 = vadd.f32 %v1802_v22, %v1613_v7  ;;  %v2902_v37 = vpop.f32.mrf.mxu1 }
 0x27d   : > { %v2982_v63 = vpop.f32.mrf.mxu0 }
 0x27e   : > { %v1919_v30 = vmax.f32 %v1917_v6, %v1881_v5  ;;  %v1547_v23 = vpop.f32.mrf.mxu1 }
 0x27f   : > { %v1807_v39 = vpop.f32.mrf.mxu0  ;;  %v1616_v61 = vadd.f32 %v1547_v23, %v4048_v17 }
 0x280   : > { %v1882_v19 = vadd.f32 %v1807_v39, %v1614_v15  ;;  %v2905_v27 = vpop.f32.mrf.mxu1 }
 0x281   : > { %v2985_v35 = vpop.f32.mrf.mxu0 }
 0x282   : > { %v1904_v38 = vmax.f32 %v1902_v29, %v1882_v19  ;;  %v1550_v16 = vpop.f32.mrf.mxu1 }
 0x283   : > { %v1810_v51 = vpop.f32.mrf.mxu0  ;;  %v1617_v59 = vadd.f32 %v1550_v16, %v4051_v40 }
 0x284   : > { %v1883_v8 = vadd.f32 %v1810_v51, %v1615_v3  ;;  %v2906_v43 = vpop.f32.mrf.mxu1 }
 0x285   : > { %v2986_v44 = vpop.f32.mrf.mxu0 }
 0x286   : > { %v1920_v9 = vmax.f32 %v1918_v57, %v1883_v8  ;;  %v1555_v45 = vpop.f32.mrf.mxu1 }
 0x287   : > { %v1815_v32 = vpop.f32.mrf.mxu0  ;;  %v1618_v36 = vadd.f32 %v1555_v45, %v4054_v60 }
 0x288   : > { %v1884_v18 = vadd.f32 %v1815_v32, %v1616_v61  ;;  %v2909_v24 = vpop.f32.mrf.mxu1 }
 0x289   : > { %v2989_v2 = vpop.f32.mrf.mxu0 }
 0x28a   : > { %v1905_v6 = vmax.f32 %v1903_v31, %v1884_v18  ;;  %v1558_v25 = vpop.f32.mrf.mxu1 }
 0x28b   : > { %v1818_v47 = vpop.f32.mrf.mxu0  ;;  %v1619_v62 = vadd.f32 %v1558_v25, %v4057_v50 }
 0x28c   : > { %v1885_v48 = vadd.f32 %v1818_v47, %v1617_v59  ;;  %v2910_v54 = vpop.f32.mrf.mxu1 }
 0x28d   : > { %v2990_v46 = vpop.f32.mrf.mxu0 }
 0x28e   : > { %v1921_v10 = vmax.f32 %v1919_v30, %v1885_v48  ;;  %v1563_v29 = vpop.f32.mrf.mxu1 }
 0x28f   : > { %v1823_v28 = vpop.f32.mrf.mxu0  ;;  %v1620_v41 = vadd.f32 %v1563_v29, %v4066_v26 }
 0x290   : > { %v1886_v17 = vadd.f32 %v1823_v28, %v1618_v36  ;;  %v2913_v14 = vpop.f32.mrf.mxu1 }
 0x291   : > { %v2993_v34 = vpop.f32.mrf.mxu0 }
 0x292   : > { %v1906_v21 = vmax.f32 %v1904_v38, %v1886_v17  ;;  %v1566_v56 = vpop.f32.mrf.mxu1 }
 0x293   : > { %v1826_v57 = vpop.f32.mrf.mxu0  ;;  %v1621_v22 = vadd.f32 %v1566_v56, %v4069_v52 }
 0x294   : > { %v1887_v40 = vadd.f32 %v1826_v57, %v1619_v62  ;;  %v2914_v11 = vpop.f32.mrf.mxu1 }
 0x295   : > { %v2994_v53 = vpop.f32.mrf.mxu0 }
 0x296   : > { %v1922_v20 = vmax.f32 %v1920_v9, %v1887_v40  ;;  %v1571_v0 = vpop.f32.mrf.mxu1 }
 0x297   : > { %v1831_v7 = vpop.f32.mrf.mxu0  ;;  %v1622_v23 = vadd.f32 %v1571_v0, %v4072_v55 }
 0x298   : > { %v1888_v60 = vadd.f32 %v1831_v7, %v1620_v41  ;;  %v2917_v31 = vpop.f32.mrf.mxu1 }
 0x299   : > { %v2997_v58 = vpop.f32.mrf.mxu0 }
 0x29a   : > { %v1907_v5 = vmax.f32 %v1905_v6, %v1888_v60  ;;  %v1574_v37 = vpop.f32.mrf.mxu1 }
 0x29b   : > { %v1834_v63 = vpop.f32.mrf.mxu0  ;;  %v1623_v38 = vadd.f32 %v1574_v37, %v4075_v12 }
 0x29c   : > { %v1889_v50 = vadd.f32 %v1834_v63, %v1621_v22  ;;  %v2918_v15 = vpop.f32.mrf.mxu1 }
 0x29d   : > { %v2998_v30 = vpop.f32.mrf.mxu0 }
 0x29e   : > { %v1923_v39 = vmax.f32 %v1921_v10, %v1889_v50  ;;  %v1579_v19 = vpop.f32.mrf.mxu1 }
 0x29f   : > { %v1839_v27 = vpop.f32.mrf.mxu0  ;;  %v1624_v61 = vadd.f32 %v1579_v19, %v4084_v42 }
 0x2a0   : > { %v1890_v26 = vadd.f32 %v1839_v27, %v1622_v23  ;;  %v2921_v35 = vpop.f32.mrf.mxu1 }
 0x2a1   : > { %v3001_v3 = vpop.f32.mrf.mxu0 }
 0x2a2   : > { %v1908_v16 = vmax.f32 %v1906_v21, %v1890_v26  ;;  %v1582_v51 = vpop.f32.mrf.mxu1 }
 0x2a3   : > { %v1842_v8 = vpop.f32.mrf.mxu0  ;;  %v1625_v2 = vadd.f32 %v1582_v51, %v4087_v13  ;;  %v2445_v13 = vld [vmem:[%s4152_s2] ss:$0 sm:$0xff] }
 0x2a4   : > { %v1891_v52 = vadd.f32 %v1842_v8, %v1623_v38  ;;  %v2922_v43 = vpop.f32.mrf.mxu1 }
 0x2a5   : > { %v3002_v44 = vpop.f32.mrf.mxu0 }
 0x2a6   : > { %v1924_v9 = vmax.f32 %v1922_v20, %v1891_v52  ;;  %v1587_v45 = vpop.f32.mrf.mxu1 }
 0x2a7   : > { %v1847_v32 = vpop.f32.mrf.mxu0  ;;  %v1626_v54 = vadd.f32 %v1587_v45, %v4091_v1 }
 0x2a8   : > { %v1892_v55 = vadd.f32 %v1847_v32, %v1624_v61  ;;  %v2925_v18 = vpop.f32.mrf.mxu1 }
 0x2a9   : > { %v3005_v24 = vpop.f32.mrf.mxu0 }
 0x2aa   : > { %v1909_v59 = vmax.f32 %v1907_v5, %v1892_v55  ;;  %v1590_v6 = vpop.f32.mrf.mxu1 }
 0x2ab   : > { %v1850_v25 = vpop.f32.mrf.mxu0  ;;  %v1627_v29 = vadd.f32 %v1590_v6, %v4095_v49  ;;  %v1956_v49 = vld [vmem:[%s4154_s4] sm:$0x3] }
 0x2ac   : > { %v1893_v12 = vadd.f32 %v1850_v25, %v1625_v2  ;;  %v2926_v47 = vpop.f32.mrf.mxu1  ;;  %v1965_v41 = vrot.slane %v1956_v49, %v3243_v4  ;;  %v1961_v4 = vrot.slane %v1956_v49, %v3302_v33 }
 0x2ad   : > { %v3006_v48 = vpop.f32.mrf.mxu0 }
 0x2ae   : > { %v1925_v46 = vmax.f32 %v1923_v39, %v1893_v12 }
 0x2af   : > { %v1855_v36 = vpop.f32.mrf.mxu0 }
 0x2b0   : > { %v1894_v10 = vadd.f32 %v1855_v36, %v1626_v54 }
 0x2b1   : > { %v3009_v42 = vpop.f32.mrf.mxu0 }
 0x2b2   : > { %v1910_v28 = vmax.f32 %v1908_v16, %v1894_v10 }
 0x2b3   : > { %v1858_v17 = vpop.f32.mrf.mxu0 }
 0x2b4   : > { %v1911_v14 = vmax.f32 %v1910_v28, %v1909_v59  ;;  %v1895_v34 = vadd.f32 %v1858_v17, %v1627_v29 }
 0x2b5   : > { %v3010_v62 = vpop.f32.mrf.mxu0 }
 0x2b6   : > { %v1926_v21 = vmax.f32 %v1924_v9, %v1895_v34  ;;  %v1935_v56 = vadd.f32 %v2445_v13, %v1911_v14 }
 0x2b8   : > { %v1927_v57 = vmax.f32 %v1926_v21, %v1925_v46  ;;  %v1937_v1 = vmax.f32 %v1935_v56, 0.0 }
 0x2ba   : > { %v1936_v40 = vadd.f32 %v2445_v13, %v1927_v57 }
 0x2bc   : > { %v1938_v11 = vmax.f32 %v1936_v40, 0.0 }
 0x2be   : > { %v1939_v53 = vpack.c.bf16 %v1938_v11, %v1937_v1 }
 0x2c0   : > { %2081 = vmatmul.mubr.bf16.vlgmr.msra.gmra.mxu1 %v1939_v53 }
 0x380   : > { %v2082_v20 = vpop.f32.mrf.mxu1 }
 0x381   : > { %v2083_v30 = vadd.f32 %v2082_v20, %v1961_v4 }
 0x382   : > { %v2084_v0 = vpop.f32.mrf.mxu1 }
 0x383   : > { %v2085_v7 = vadd.f32 %v2084_v0, %v1965_v41  ;;  %v2091_v39 = vmax.f32 %v2083_v30, 0.0 }
 0x384   : > { %v2086_v60 = vpop.f32.mrf.mxu1 }
 0x385   : > { %v2462_v31 = vmul.f32 -1.442695, %v2085_v7  ;;  %v2087_v27 = vadd.f32 %v2086_v60, %v1961_v4 }
 0x386   : > { %v2088_v58 = vpop.f32.mrf.mxu1 }
 0x387   : > { %3117 = vpow2.f32 %v2462_v31  ;;  %v2089_v22 = vadd.f32 %v2088_v58, %v1965_v41  ;;  %v2092_v16 = vmax.f32 %v2087_v27, 0.0 }
 0x389   : > { %v2463_v5 = vmul.f32 -1.442695, %v2089_v22 }
 0x38b   : > { %3119 = vpow2.f32 %v2463_v5 }
 0x394   : > { %v3118_v37 = vpop.eup %3117 }
 0x395   : > { %v2099_v63 = vadd.f32 1.0, %v3118_v37 }
 0x397   : > { %3121 = vrcp.f32 %v2099_v63 }
 0x398   : > { %v3120_v50 = vpop.eup %3119 }
 0x399   : > { %v2100_v15 = vadd.f32 1.0, %v3120_v50 }
 0x39b   : > { %3123 = vrcp.f32 %v2100_v15 }
 0x3a4   : > { %v3122_v23 = vpop.eup %3121 }
 0x3a5   : > { %v2107_v19 = vsub.f32 1.0, %v3122_v23  ;;  %v2105_v26 = vmul.f32 %v3122_v23, %v2091_v39 }
 0x3a7   : > { %v2109_v35 = vmul.f32 %v2107_v19, %v1937_v1 }
 0x3a8   : > { %v3124_v3 = vpop.eup %3123 }
 0x3a9   : > { %v2111_v38 = vadd.f32 %v2109_v35, %v2105_v26  ;;  %v2108_v51 = vsub.f32 1.0, %v3124_v3  ;;  %v2106_v33 = vmul.f32 %v3124_v3, %v2092_v16 }
 0x3ab   : > { %2113 = vst [vmem:[%s239_s27] sm:$0xff] %v2111_v38  ;;  %v2110_v8 = vmul.f32 %v2108_v51, %v1938_v11 }
 0x3ad   : > { %v2112_v52 = vadd.f32 %v2110_v8, %v2106_v33 }
 0x3af   : > { %2114 = vst [vmem:[%s239_s27 + $0x8] sm:$0xff] %v2112_v52 }
 0x3b0 PF: > { %s16_s18 = sadd.s32 1, %s3161_s18  }
 0x3b1   : > { %p13_p2 = scmp.ge.s32.totalorder %s16_s18, 4  }
 0x3b3   :  { %15 = sbr.rel (!%p13_p2) target bundleno = 1 (0x1), region = 79 }
 0x3b8   :  { %2137 = vsyncpa [#allocation3], 1 }
 0x3b9   :  { %2139 = vsyncpa [#allocation3 + $0x1], 1 }

</bundles_post_ra>
